<compile_context>
chip_gen: v7x
topology: tpu7x:2x2x1
jax: 0.10.0
libtpu: 0.0.40
codegen_flags: <defaults>
</compile_context>

<pallas_src>
import functools

import jax
import jax.numpy as jnp
from jax import lax
from jax.experimental import pallas as pl
from jax.experimental.pallas import tpu as pltpu


_COMPUTE_DTYPE = jnp.bfloat16          # MXU operand / activation storage dtype
_TM = 1024                             # row-tile cap (pixels per grid step)
_CPARAMS = pltpu.CompilerParams(
    dimension_semantics=("parallel",),              # shard the row grid across TCs (v7x)
    vmem_limit_bytes=32 * 1024 * 1024,              # explicit; tiles stay far below this
)


def _round_up(x, m):
    return (x + m - 1) // m * m


def _row_tiles(m):
    tm = min(_TM, _round_up(m, 8))
    return tm, _round_up(m, tm)


def _bcast_spec(shape):
    # full-array operand (weights / biases): same block every grid step.
    return pl.BlockSpec(shape, lambda i: (0,) * len(shape))


# ----------------------------- Pallas kernels ------------------------------

def _conv_pool_kernel(x_ref, w_ref, b_ref, o_ref):
    # x_ref: (4, TM, K) -- the 4 pool-phase im2col row blocks of one output tile.
    # o_ref: (TM, Cout) = maxpool2x2(relu(conv3x3 + b)) for that tile.
    w = w_ref[...]
    y = jnp.dot(x_ref[0], w, preferred_element_type=jnp.float32)
    for p in range(1, 4):
        y = jnp.maximum(y, jnp.dot(x_ref[p], w, preferred_element_type=jnp.float32))
    o_ref[...] = jnp.maximum(y + b_ref[...], 0.0).astype(o_ref.dtype)


def _mm_bias_kernel(x_ref, w_ref, b_ref, o_ref, *, relu):
    # (TM, K) @ (K, N) + (1, N)  [+ ReLU]
    y = jnp.dot(x_ref[...], w_ref[...], preferred_element_type=jnp.float32) + b_ref[...]
    if relu:
        y = jnp.maximum(y, 0.0)
    o_ref[...] = y.astype(o_ref.dtype)


def _skip_fuse_kernel(x_ref, w_ref, b_ref, s_ref, o_ref):
    # relu( relu(x @ w + b) + skip )   -- skip is the deconv pre-activation (f32).
    y = jnp.dot(x_ref[...], w_ref[...], preferred_element_type=jnp.float32) + b_ref[...]
    y = jnp.maximum(y, 0.0) + s_ref[...]
    o_ref[...] = jnp.maximum(y, 0.0).astype(o_ref.dtype)


def _deconv_classifier_kernel(x_ref, w1_ref, b1_ref, w2_ref, b2_ref, o_ref):
    # relu(x @ w1 + b1) @ w2 + b2   (w2 = block-diagonal per-parity classifier weights).
    y = jnp.dot(x_ref[...], w1_ref[...], preferred_element_type=jnp.float32) + b1_ref[...]
    y = jnp.maximum(y, 0.0)
    o_ref[...] = (jnp.dot(y, w2_ref[...], preferred_element_type=jnp.float32)
                  + b2_ref[...]).astype(o_ref.dtype)


# ------------------------------ kernel launchers ----------------------------

def pallas_conv_pool(cols, wmat, b, out_dtype):
    # cols: (4, M, K) bf16; wmat: (K, Cout) bf16; b: (1, Cout) f32 -> (M, Cout)
    _, m, k = cols.shape
    cout = wmat.shape[1]
    tm, mp = _row_tiles(m)
    if mp != m:
        cols = jnp.pad(cols, ((0, 0), (0, mp - m), (0, 0)))
    out = pl.pallas_call(
        _conv_pool_kernel,
        out_shape=jax.ShapeDtypeStruct((mp, cout), out_dtype),
        grid=(mp // tm,),
        in_specs=[pl.BlockSpec((4, tm, k), lambda i: (0, i, 0)),
                  _bcast_spec((k, cout)),
                  _bcast_spec((1, cout))],
        out_specs=pl.BlockSpec((tm, cout), lambda i: (i, 0)),
        compiler_params=_CPARAMS,
    )(cols, wmat, b)
    return out[:m]


def pallas_matmul_bias(x2d, wmat, b, relu, out_dtype):
    m, k = x2d.shape
    cout = wmat.shape[1]
    tm, mp = _row_tiles(m)
    if mp != m:
        x2d = jnp.pad(x2d, ((0, mp - m), (0, 0)))
    out = pl.pallas_call(
        functools.partial(_mm_bias_kernel, relu=relu),
        out_shape=jax.ShapeDtypeStruct((mp, cout), out_dtype),
        grid=(mp // tm,),
        in_specs=[pl.BlockSpec((tm, k), lambda i: (i, 0)),
                  _bcast_spec((k, cout)),
                  _bcast_spec((1, cout))],
        out_specs=pl.BlockSpec((tm, cout), lambda i: (i, 0)),
        compiler_params=_CPARAMS,
    )(x2d, wmat, b)
    return out[:m]


def pallas_skip_fuse(x2d, wmat, b, skip2d, out_dtype):
    m, k = x2d.shape
    cout = wmat.shape[1]
    tm, mp = _row_tiles(m)
    if mp != m:
        x2d = jnp.pad(x2d, ((0, mp - m), (0, 0)))
        skip2d = jnp.pad(skip2d, ((0, mp - m), (0, 0)))
    out = pl.pallas_call(
        _skip_fuse_kernel,
        out_shape=jax.ShapeDtypeStruct((mp, cout), out_dtype),
        grid=(mp // tm,),
        in_specs=[pl.BlockSpec((tm, k), lambda i: (i, 0)),
                  _bcast_spec((k, cout)),
                  _bcast_spec((1, cout)),
                  pl.BlockSpec((tm, cout), lambda i: (i, 0))],
        out_specs=pl.BlockSpec((tm, cout), lambda i: (i, 0)),
        compiler_params=_CPARAMS,
    )(x2d, wmat, b, skip2d)
    return out[:m]


def pallas_deconv_classifier(x2d, w1, b1, w2, b2):
    m, k = x2d.shape
    n_mid = w1.shape[1]
    n_out = w2.shape[1]
    tm, mp = _row_tiles(m)
    if mp != m:
        x2d = jnp.pad(x2d, ((0, mp - m), (0, 0)))
    out = pl.pallas_call(
        _deconv_classifier_kernel,
        out_shape=jax.ShapeDtypeStruct((mp, n_out), jnp.float32),
        grid=(mp // tm,),
        in_specs=[pl.BlockSpec((tm, k), lambda i: (i, 0)),
                  _bcast_spec((k, n_mid)),
                  _bcast_spec((1, n_mid)),
                  _bcast_spec((n_mid, n_out)),
                  _bcast_spec((1, n_out))],
        out_specs=pl.BlockSpec((tm, n_out), lambda i: (i, 0)),
        compiler_params=_CPARAMS,
    )(x2d, w1, b1, w2, b2)
    return out[:m]


# ------------------------------ layer wrappers -------------------------------

def conv3x3_relu_pool(x, wmat, b):
    # x: (N, H, W, Cin) -> maxpool2x2(relu(conv3x3(x) + b)): (N, H/2, W/2, Cout)
    n, h, w, cin = x.shape
    hh, wh = h // 2, w // 2
    k, cout = wmat.shape
    xpad = jnp.pad(x.astype(_COMPUTE_DTYPE), ((0, 0), (1, 1), (1, 1), (0, 0)))
    planes = []
    for py in range(2):
        for px in range(2):
            taps = [xpad[:, py + dy:py + dy + h:2, px + dx:px + dx + w:2, :]
                    for dy in range(3) for dx in range(3)]
            planes.append(jnp.concatenate(taps, axis=-1).reshape(n * hh * wh, k))
    cols = jnp.stack(planes, axis=0)                      # (4, N*Hh*Wh, 9*Cin)
    out = pallas_conv_pool(cols, wmat, b, _COMPUTE_DTYPE)
    return out.reshape(n, hh, wh, cout)


def conv1x1_relu(x, wmat, b):
    n, h, w, cin = x.shape
    cout = wmat.shape[1]
    y = pallas_matmul_bias(x.reshape(n * h * w, cin).astype(_COMPUTE_DTYPE),
                           wmat, b, relu=True, out_dtype=_COMPUTE_DTYPE)
    return y.reshape(n, h, w, cout)


def _deconv_xcat(x):
    # 4 shifted copies (x[m+a, n+s]) of the undilated input, channel-concatenated.
    n, h, w, cin = x.shape
    xp = jnp.pad(x.astype(_COMPUTE_DTYPE), ((0, 0), (0, 1), (0, 1), (0, 0)))
    shifts = [xp[:, a:a + h, s:s + w, :] for a in range(2) for s in range(2)]
    return jnp.concatenate(shifts, axis=-1).reshape(n * h * w, 4 * cin)


def deconv3x3_s2_pre(x, wcat, bcat):
    # ConvTranspose2d(k=3, s=2, p=1, op=1) via output-parity decomposition.
    # Returns the pre-activation (bias included, no ReLU): (N, 2H, 2W, Cout), f32.
    n, h, w, _ = x.shape
    cout = wcat.shape[1] // 4
    y = pallas_matmul_bias(_deconv_xcat(x), wcat, bcat, relu=False, out_dtype=jnp.float32)
    y = y.reshape(n, h, w, 2, 2, cout).transpose(0, 1, 3, 2, 4, 5)    # depth-to-space
    return y.reshape(n, 2 * h, 2 * w, cout)


def skip_add_relu(x, wmat, b, deconv_pre):
    # relu( relu(conv1x1(x) + b) + deconv_pre )
    n, h, w, cin = x.shape
    cout = wmat.shape[1]
    y = pallas_skip_fuse(x.reshape(n * h * w, cin).astype(_COMPUTE_DTYPE),
                         wmat, b, deconv_pre.reshape(n * h * w, cout), _COMPUTE_DTYPE)
    return y.reshape(n, h, w, cout)


def deconv3x3_s2_classifier(x, wcat, bcat, wcls, bcls):
    # relu(ConvTranspose2d(...)(x)) followed by the 1x1 classifier, fused in one kernel.
    n, h, w, _ = x.shape
    y = pallas_deconv_classifier(_deconv_xcat(x), wcat, bcat, wcls, bcls)    # (M, 4)
    y = y.reshape(n, h, w, 2, 2, 1).transpose(0, 1, 3, 2, 4, 5)
    return y.reshape(n, 2 * h, 2 * w, 1)


# ------------------------------ forward pass --------------------------------

def endewithpooling_forward(x_nchw, prep):
    # activation='relu', batchnorm=False, softmax=False path of EnDeWithPooling.forward.
    x = jnp.transpose(x_nchw, (0, 2, 3, 1)).astype(jnp.float32)       # NCHW -> NHWC
    c1 = conv3x3_relu_pool(x, *prep['conv1'])            # (N, H/2, W/2, 16)
    c2 = conv3x3_relu_pool(c1, *prep['conv2'])           # (N, H/4, W/4, 32)
    c3 = conv3x3_relu_pool(c2, *prep['conv3'])           # (N, H/8, W/8, 64)
    inter = conv1x1_relu(c3, *prep['intermediate'])      # (N, H/8, W/8, 64)
    d3_pre = deconv3x3_s2_pre(inter, *prep['deconv3'])   # (N, H/4, W/4, 32) pre-act
    d3 = skip_add_relu(c2, *prep['skip2'], d3_pre)
    d2_pre = deconv3x3_s2_pre(d3, *prep['deconv2'])      # (N, H/2, W/2, 16) pre-act
    d2 = skip_add_relu(c1, *prep['skip1'], d2_pre)
    score = deconv3x3_s2_classifier(d2, *prep['deconv1'], *prep['classifier'])
    return jnp.transpose(score, (0, 3, 1, 2))            # NHWC -> NCHW, (N, 1, H, W)
# TODO(synk): batchnorm=True branch (BatchNorm2d), SELU activation and softmax head are
# not wired up; the exercised configuration is (relu, batchnorm=False, softmax=False).


# --------------------------- one-time weight prep ----------------------------

def _deconv_parity_weights(w, b):
    # ConvTranspose2d(k=3, s=2, p=1, op=1): output pixel (2m+py, 2n+px) only sees input
    # pixels (m+a, n+s), with the kernel tap per spatial dim given by tap[(parity, shift)].
    cin, cout = w.shape[0], w.shape[1]
    tap = {(0, 0): 1, (1, 0): 2, (1, 1): 0}
    wcat = jnp.zeros((4 * cin, 4 * cout), jnp.float32)
    for py in range(2):
        for px in range(2):
            pidx = 2 * py + px
            for a in range(2):
                for s in range(2):
                    if (py, a) in tap and (px, s) in tap:
                        dy, dx = tap[(py, a)], tap[(px, s)]
                        sidx = 2 * a + s
                        wcat = wcat.at[sidx * cin:(sidx + 1) * cin,
                                       pidx * cout:(pidx + 1) * cout].set(w[:, :, dy, dx])
    return wcat, jnp.concatenate([b] * 4)


def prepare_params(p):
    """One-time weight repacking: im2col conv matrices, parity deconv matrices and the
    block-diagonal classifier, pre-transposed and cast to the MXU operand dtype."""
    prep = {}
    for name in ('conv1', 'conv2', 'conv3'):
        w, b = p[name]                                    # (Cout, Cin, 3, 3)
        cout, cin = w.shape[0], w.shape[1]
        wmat = jnp.transpose(w, (2, 3, 1, 0)).reshape(9 * cin, cout)
        prep[name] = (wmat.astype(_COMPUTE_DTYPE), b.reshape(1, cout).astype(jnp.float32))
    for name in ('intermediate', 'skip1', 'skip2'):
        w, b = p[name]                                    # (Cout, Cin, 1, 1)
        wmat = w[:, :, 0, 0].T
        prep[name] = (wmat.astype(_COMPUTE_DTYPE), b.reshape(1, -1).astype(jnp.float32))
    for name in ('deconv3', 'deconv2', 'deconv1'):
        w, b = p[name]                                    # (Cin, Cout, 3, 3)
        wcat, bcat = _deconv_parity_weights(w, b)
        prep[name] = (wcat.astype(_COMPUTE_DTYPE), bcat.reshape(1, -1).astype(jnp.float32))
    wc, bc = p['classifier']                              # (1, 8, 1, 1), (1,)
    wvec = wc[:, :, 0, 0].reshape(-1)
    ncls = wvec.shape[0]
    w2 = jnp.zeros((4 * ncls, 4), jnp.float32)
    for ph in range(4):
        w2 = w2.at[ph * ncls:(ph + 1) * ncls, ph].set(wvec)
    prep['classifier'] = (w2, jnp.full((1, 4), bc[0], jnp.float32))
    return prep


# -------------------------- pure-JAX reference ------------------------------

def _ref_conv3x3(x, w, b, relu):
    w_hwio = jnp.transpose(w, (2, 3, 1, 0))
    y = lax.conv_general_dilated(x, w_hwio, (1, 1), [(1, 1), (1, 1)],
                                 dimension_numbers=('NHWC', 'HWIO', 'NHWC')) + b
    return jnp.maximum(y, 0.0) if relu else y


def _ref_conv1x1(x, w, b, relu):
    y = jnp.einsum('nhwc,oc->nhwo', x, w[:, :, 0, 0]) + b
    return jnp.maximum(y, 0.0) if relu else y


def _ref_deconv(x, w, b, skip, relu):
    w_hwio = jnp.transpose(w[:, :, ::-1, ::-1], (2, 3, 0, 1))
    y = lax.conv_general_dilated(x, w_hwio, (1, 1), [(1, 2), (1, 2)],
                                 lhs_dilation=(2, 2),
                                 dimension_numbers=('NHWC', 'HWIO', 'NHWC')) + b
    if skip is not None:
        y = y + skip
    return jnp.maximum(y, 0.0) if relu else y


def _ref_pool(x):
    n, h, w, c = x.shape
    return jnp.max(x.reshape(n, h // 2, 2, w // 2, 2, c), axis=(2, 4))


def reference_forward(x_nchw, p):
    x = jnp.transpose(x_nchw, (0, 2, 3, 1)).astype(jnp.float32)
    c1 = _ref_pool(_ref_conv3x3(x, *p['conv1'], relu=True))
    c2 = _ref_pool(_ref_conv3x3(c1, *p['conv2'], relu=True))
    c3 = _ref_pool(_ref_conv3x3(c2, *p['conv3'], relu=True))
    inter = _ref_conv1x1(c3, *p['intermediate'], relu=True)
    d3 = _ref_deconv(inter, *p['deconv3'], _ref_conv1x1(c2, *p['skip2'], relu=True), True)
    d2 = _ref_deconv(d3, *p['deconv2'], _ref_conv1x1(c1, *p['skip1'], relu=True), True)
    d1 = _ref_deconv(d2, *p['deconv1'], None, True)
    score = _ref_conv1x1(d1, *p['classifier'], relu=False)
    return jnp.transpose(score, (0, 3, 1, 2))


# ------------------------------- parameters ---------------------------------

def init_params(key, num_channels):
    keys = jax.random.split(key, 10)

    def conv(k, cout, cin, ksz):                       # nn.Conv2d weight layout
        kw, kb = jax.random.split(k)
        std = (2.0 / (ksz * ksz * cout)) ** 0.5
        return (std * jax.random.normal(kw, (cout, cin, ksz, ksz), jnp.float32),
                0.01 * jax.random.normal(kb, (cout,), jnp.float32))

    def deconv(k, cin, cout, ksz):                     # nn.ConvTranspose2d layout
        kw, kb = jax.random.split(k)
        std = (2.0 / (ksz * ksz * cout)) ** 0.5
        return (std * jax.random.normal(kw, (cin, cout, ksz, ksz), jnp.float32),
                0.01 * jax.random.normal(kb, (cout,), jnp.float32))

    return {
        'conv1': conv(keys[0], 16, num_channels, 3),
        'conv2': conv(keys[1], 32, 16, 3),
        'conv3': conv(keys[2], 64, 32, 3),
        'intermediate': conv(keys[3], 64, 64, 1),
        'skip1': conv(keys[4], 16, 16, 1),
        'skip2': conv(keys[5], 32, 32, 1),
        'deconv3': deconv(keys[6], 64, 32, 3),
        'deconv2': deconv(keys[7], 32, 16, 3),
        'deconv1': deconv(keys[8], 16, 8, 3),
        'classifier': conv(keys[9], 1, 8, 1),
    }


# ---------------------------------- main -------------------------------------

if __name__ == "__main__":
    N, C, H, W = 2, 4, 16, 16
    key = jax.random.PRNGKey(0)
    kx, kp = jax.random.split(key)
    x = jax.random.normal(kx, (N, C, H, W), jnp.float32)
    params = init_params(kp, C)
    prep = prepare_params(params)

    fwd = jax.jit(endewithpooling_forward)
    out = jax.block_until_ready(fwd(x, prep))
    ref = jax.block_until_ready(reference_forward(x, params))

    assert out.shape == (N, 1, H, W), out.shape
    err = float(jnp.max(jnp.abs(out - ref)))
    tol = 3e-2 + 3e-2 * float(jnp.max(jnp.abs(ref)))     # bf16 operands, f32 accumulation
    assert err < tol, f"max abs error vs reference: {err} (tol {tol})"
    print("KERNEL_OK")
</pallas_src>

<mosaic_0001>
module attributes {stable_mosaic.version = 11 : i64} {
  func.func @_conv_pool_kernel(%arg0: i32, %arg1: memref<4x128x36xbf16, #tpu.memory_space<vmem>>, %arg2: memref<36x16xbf16, #tpu.memory_space<vmem>>, %arg3: memref<1x16xf32, #tpu.memory_space<vmem>>, %arg4: memref<128x16xbf16, #tpu.memory_space<vmem>>) attributes {dimension_semantics = [#tpu.dimension_semantics<parallel>], iteration_bounds = array<i64: 1>, scalar_prefetch = 0 : i64, scratch_operands = 0 : i64, tpu.core_type = #tpu.core_type<tc>, window_params = [{transform_indices = @transform_0, window_bounds = array<i64: 4, 128, 36>}, {pipeline_mode = #tpu.pipeline_mode<synchronous>, transform_indices = @transform_1, window_bounds = array<i64: 36, 16>}, {pipeline_mode = #tpu.pipeline_mode<synchronous>, transform_indices = @transform_2, window_bounds = array<i64: 1, 16>}, {transform_indices = @transform_3, window_bounds = array<i64: 128, 16>}]} {
    %c0 = arith.constant 0 : index
    %c0_0 = arith.constant 0 : index
    %0 = vector.load %arg2[%c0, %c0_0] : memref<36x16xbf16, #tpu.memory_space<vmem>>, vector<36x16xbf16>
    %c0_1 = arith.constant 0 : index
    %c0_2 = arith.constant 0 : index
    %c0_3 = arith.constant 0 : index
    %1 = vector.load %arg1[%c0_1, %c0_2, %c0_3] : memref<4x128x36xbf16, #tpu.memory_space<vmem>>, vector<1x128x36xbf16>
    %2 = vector.shape_cast %1 : vector<1x128x36xbf16> to vector<128x36xbf16>
    %cst = arith.constant dense<0.000000e+00> : vector<128x16xf32>
    %3 = tpu.matmul %2, %0, %cst {dimension_numbers = #tpu.dot_dimension_numbers<[1], [0], [0], [1], [0, 0, 1, 1], [], []>} : vector<128x36xbf16>, vector<36x16xbf16>, vector<128x16xf32> -> vector<128x16xf32>
    %c1 = arith.constant 1 : index
    %c0_4 = arith.constant 0 : index
    %c0_5 = arith.constant 0 : index
    %4 = vector.load %arg1[%c1, %c0_4, %c0_5] : memref<4x128x36xbf16, #tpu.memory_space<vmem>>, vector<1x128x36xbf16>
    %5 = vector.shape_cast %4 : vector<1x128x36xbf16> to vector<128x36xbf16>
    %cst_6 = arith.constant dense<0.000000e+00> : vector<128x16xf32>
    %6 = tpu.matmul %5, %0, %cst_6 {dimension_numbers = #tpu.dot_dimension_numbers<[1], [0], [0], [1], [0, 0, 1, 1], [], []>} : vector<128x36xbf16>, vector<36x16xbf16>, vector<128x16xf32> -> vector<128x16xf32>
    %7 = arith.maximumf %3, %6 : vector<128x16xf32>
    %c2 = arith.constant 2 : index
    %c0_7 = arith.constant 0 : index
    %c0_8 = arith.constant 0 : index
    %8 = vector.load %arg1[%c2, %c0_7, %c0_8] : memref<4x128x36xbf16, #tpu.memory_space<vmem>>, vector<1x128x36xbf16>
    %9 = vector.shape_cast %8 : vector<1x128x36xbf16> to vector<128x36xbf16>
    %cst_9 = arith.constant dense<0.000000e+00> : vector<128x16xf32>
    %10 = tpu.matmul %9, %0, %cst_9 {dimension_numbers = #tpu.dot_dimension_numbers<[1], [0], [0], [1], [0, 0, 1, 1], [], []>} : vector<128x36xbf16>, vector<36x16xbf16>, vector<128x16xf32> -> vector<128x16xf32>
    %11 = arith.maximumf %7, %10 : vector<128x16xf32>
    %c3 = arith.constant 3 : index
    %c0_10 = arith.constant 0 : index
    %c0_11 = arith.constant 0 : index
    %12 = vector.load %arg1[%c3, %c0_10, %c0_11] : memref<4x128x36xbf16, #tpu.memory_space<vmem>>, vector<1x128x36xbf16>
    %13 = vector.shape_cast %12 : vector<1x128x36xbf16> to vector<128x36xbf16>
    %cst_12 = arith.constant dense<0.000000e+00> : vector<128x16xf32>
    %14 = tpu.matmul %13, %0, %cst_12 {dimension_numbers = #tpu.dot_dimension_numbers<[1], [0], [0], [1], [0, 0, 1, 1], [], []>} : vector<128x36xbf16>, vector<36x16xbf16>, vector<128x16xf32> -> vector<128x16xf32>
    %15 = arith.maximumf %11, %14 : vector<128x16xf32>
    %c0_13 = arith.constant 0 : index
    %c0_14 = arith.constant 0 : index
    %16 = vector.load %arg3[%c0_13, %c0_14] : memref<1x16xf32, #tpu.memory_space<vmem>>, vector<1x16xf32>
    %17 = vector.broadcast %16 : vector<1x16xf32> to vector<128x16xf32>
    %18 = arith.addf %15, %17 : vector<128x16xf32>
    %cst_15 = arith.constant 0.000000e+00 : f32
    %19 = vector.broadcast %cst_15 : f32 to vector<128x16xf32>
    %20 = arith.maximumf %18, %19 : vector<128x16xf32>
    %21 = arith.truncf %20 : vector<128x16xf32> to vector<128x16xbf16>
    %c0_16 = arith.constant 0 : index
    %c0_17 = arith.constant 0 : index
    %22 = vector.load %arg4[%c0_16, %c0_17] : memref<128x16xbf16, #tpu.memory_space<vmem>>, vector<128x16xbf16>
    tpu.vector_store %arg4[%c0_16, %c0_17], %21 {strides = array<i32>} : memref<128x16xbf16, #tpu.memory_space<vmem>>, vector<128x16xbf16>,
    return
  }
  func.func @transform_0(%arg0: i32) -> (i32, i32, i32) {
    %c0_i32 = arith.constant 0 : i32
    %c0_i32_0 = arith.constant 0 : i32
    %c0_i32_1 = arith.constant 0 : i32
    return %c0_i32, %arg0, %c0_i32_0 : i32, i32, i32
  }
  func.func @transform_1(%arg0: i32) -> (i32, i32) {
    %c0_i32 = arith.constant 0 : i32
    %c0_i32_0 = arith.constant 0 : i32
    %c0_i32_1 = arith.constant 0 : i32
    return %c0_i32, %c0_i32_0 : i32, i32
  }
  func.func @transform_2(%arg0: i32) -> (i32, i32) {
    %c0_i32 = arith.constant 0 : i32
    %c0_i32_0 = arith.constant 0 : i32
    %c0_i32_1 = arith.constant 0 : i32
    return %c0_i32, %c0_i32_0 : i32, i32
  }
  func.func @transform_3(%arg0: i32) -> (i32, i32) {
    %c0_i32 = arith.constant 0 : i32
    %c0_i32_0 = arith.constant 0 : i32
    return %arg0, %c0_i32 : i32, i32
  }
}

module attributes {stable_mosaic.version = 11 : i64} {
  func.func @_conv_pool_kernel(%arg0: i32, %arg1: memref<4x32x144xbf16, #tpu.memory_space<vmem>>, %arg2: memref<144x32xbf16, #tpu.memory_space<vmem>>, %arg3: memref<1x32xf32, #tpu.memory_space<vmem>>, %arg4: memref<32x32xbf16, #tpu.memory_space<vmem>>) attributes {dimension_semantics = [#tpu.dimension_semantics<parallel>], iteration_bounds = array<i64: 1>, scalar_prefetch = 0 : i64, scratch_operands = 0 : i64, tpu.core_type = #tpu.core_type<tc>, window_params = [{transform_indices = @transform_0, window_bounds = array<i64: 4, 32, 144>}, {pipeline_mode = #tpu.pipeline_mode<synchronous>, transform_indices = @transform_1, window_bounds = array<i64: 144, 32>}, {pipeline_mode = #tpu.pipeline_mode<synchronous>, transform_indices = @transform_2, window_bounds = array<i64: 1, 32>}, {transform_indices = @transform_3, window_bounds = array<i64: 32, 32>}]} {
    %c0 = arith.constant 0 : index
    %c0_0 = arith.constant 0 : index
    %0 = vector.load %arg2[%c0, %c0_0] : memref<144x32xbf16, #tpu.memory_space<vmem>>, vector<144x32xbf16>
    %c0_1 = arith.constant 0 : index
    %c0_2 = arith.constant 0 : index
    %c0_3 = arith.constant 0 : index
    %1 = vector.load %arg1[%c0_1, %c0_2, %c0_3] : memref<4x32x144xbf16, #tpu.memory_space<vmem>>, vector<1x32x144xbf16>
    %2 = vector.shape_cast %1 : vector<1x32x144xbf16> to vector<32x144xbf16>
    %cst = arith.constant dense<0.000000e+00> : vector<32x32xf32>
    %3 = tpu.matmul %2, %0, %cst {dimension_numbers = #tpu.dot_dimension_numbers<[1], [0], [0], [1], [0, 0, 1, 1], [], []>} : vector<32x144xbf16>, vector<144x32xbf16>, vector<32x32xf32> -> vector<32x32xf32>
    %c1 = arith.constant 1 : index
    %c0_4 = arith.constant 0 : index
    %c0_5 = arith.constant 0 : index
    %4 = vector.load %arg1[%c1, %c0_4, %c0_5] : memref<4x32x144xbf16, #tpu.memory_space<vmem>>, vector<1x32x144xbf16>
    %5 = vector.shape_cast %4 : vector<1x32x144xbf16> to vector<32x144xbf16>
    %cst_6 = arith.constant dense<0.000000e+00> : vector<32x32xf32>
    %6 = tpu.matmul %5, %0, %cst_6 {dimension_numbers = #tpu.dot_dimension_numbers<[1], [0], [0], [1], [0, 0, 1, 1], [], []>} : vector<32x144xbf16>, vector<144x32xbf16>, vector<32x32xf32> -> vector<32x32xf32>
    %7 = arith.maximumf %3, %6 : vector<32x32xf32>
    %c2 = arith.constant 2 : index
    %c0_7 = arith.constant 0 : index
    %c0_8 = arith.constant 0 : index
    %8 = vector.load %arg1[%c2, %c0_7, %c0_8] : memref<4x32x144xbf16, #tpu.memory_space<vmem>>, vector<1x32x144xbf16>
    %9 = vector.shape_cast %8 : vector<1x32x144xbf16> to vector<32x144xbf16>
    %cst_9 = arith.constant dense<0.000000e+00> : vector<32x32xf32>
    %10 = tpu.matmul %9, %0, %cst_9 {dimension_numbers = #tpu.dot_dimension_numbers<[1], [0], [0], [1], [0, 0, 1, 1], [], []>} : vector<32x144xbf16>, vector<144x32xbf16>, vector<32x32xf32> -> vector<32x32xf32>
    %11 = arith.maximumf %7, %10 : vector<32x32xf32>
    %c3 = arith.constant 3 : index
    %c0_10 = arith.constant 0 : index
    %c0_11 = arith.constant 0 : index
    %12 = vector.load %arg1[%c3, %c0_10, %c0_11] : memref<4x32x144xbf16, #tpu.memory_space<vmem>>, vector<1x32x144xbf16>
    %13 = vector.shape_cast %12 : vector<1x32x144xbf16> to vector<32x144xbf16>
    %cst_12 = arith.constant dense<0.000000e+00> : vector<32x32xf32>
    %14 = tpu.matmul %13, %0, %cst_12 {dimension_numbers = #tpu.dot_dimension_numbers<[1], [0], [0], [1], [0, 0, 1, 1], [], []>} : vector<32x144xbf16>, vector<144x32xbf16>, vector<32x32xf32> -> vector<32x32xf32>
    %15 = arith.maximumf %11, %14 : vector<32x32xf32>
    %c0_13 = arith.constant 0 : index
    %c0_14 = arith.constant 0 : index
    %16 = vector.load %arg3[%c0_13, %c0_14] : memref<1x32xf32, #tpu.memory_space<vmem>>, vector<1x32xf32>
    %17 = vector.broadcast %16 : vector<1x32xf32> to vector<32x32xf32>
    %18 = arith.addf %15, %17 : vector<32x32xf32>
    %cst_15 = arith.constant 0.000000e+00 : f32
    %19 = vector.broadcast %cst_15 : f32 to vector<32x32xf32>
    %20 = arith.maximumf %18, %19 : vector<32x32xf32>
    %21 = arith.truncf %20 : vector<32x32xf32> to vector<32x32xbf16>
    %c0_16 = arith.constant 0 : index
    %c0_17 = arith.constant 0 : index
    %22 = vector.load %arg4[%c0_16, %c0_17] : memref<32x32xbf16, #tpu.memory_space<vmem>>, vector<32x32xbf16>
    tpu.vector_store %arg4[%c0_16, %c0_17], %21 {strides = array<i32>} : memref<32x32xbf16, #tpu.memory_space<vmem>>, vector<32x32xbf16>,
    return
  }
  func.func @transform_0(%arg0: i32) -> (i32, i32, i32) {
    %c0_i32 = arith.constant 0 : i32
    %c0_i32_0 = arith.constant 0 : i32
    %c0_i32_1 = arith.constant 0 : i32
    return %c0_i32, %arg0, %c0_i32_0 : i32, i32, i32
  }
  func.func @transform_1(%arg0: i32) -> (i32, i32) {
    %c0_i32 = arith.constant 0 : i32
    %c0_i32_0 = arith.constant 0 : i32
    %c0_i32_1 = arith.constant 0 : i32
    return %c0_i32, %c0_i32_0 : i32, i32
  }
  func.func @transform_2(%arg0: i32) -> (i32, i32) {
    %c0_i32 = arith.constant 0 : i32
    %c0_i32_0 = arith.constant 0 : i32
    %c0_i32_1 = arith.constant 0 : i32
    return %c0_i32, %c0_i32_0 : i32, i32
  }
  func.func @transform_3(%arg0: i32) -> (i32, i32) {
    %c0_i32 = arith.constant 0 : i32
    %c0_i32_0 = arith.constant 0 : i32
    return %arg0, %c0_i32 : i32, i32
  }
}

module attributes {stable_mosaic.version = 11 : i64} {
  func.func @_mm_bias_kernel(%arg0: i32, %arg1: memref<8x64xbf16, #tpu.memory_space<vmem>>, %arg2: memref<64x64xbf16, #tpu.memory_space<vmem>>, %arg3: memref<1x64xf32, #tpu.memory_space<vmem>>, %arg4: memref<8x64xbf16, #tpu.memory_space<vmem>>) attributes {dimension_semantics = [#tpu.dimension_semantics<parallel>], iteration_bounds = array<i64: 1>, scalar_prefetch = 0 : i64, scratch_operands = 0 : i64, tpu.core_type = #tpu.core_type<tc>, window_params = [{transform_indices = @transform_0, window_bounds = array<i64: 8, 64>}, {pipeline_mode = #tpu.pipeline_mode<synchronous>, transform_indices = @transform_1, window_bounds = array<i64: 64, 64>}, {pipeline_mode = #tpu.pipeline_mode<synchronous>, transform_indices = @transform_2, window_bounds = array<i64: 1, 64>}, {transform_indices = @transform_3, window_bounds = array<i64: 8, 64>}]} {
    %c0 = arith.constant 0 : index
    %c0_0 = arith.constant 0 : index
    %0 = vector.load %arg1[%c0, %c0_0] : memref<8x64xbf16, #tpu.memory_space<vmem>>, vector<8x64xbf16>
    %c0_1 = arith.constant 0 : index
    %c0_2 = arith.constant 0 : index
    %1 = vector.load %arg2[%c0_1, %c0_2] : memref<64x64xbf16, #tpu.memory_space<vmem>>, vector<64x64xbf16>
    %cst = arith.constant dense<0.000000e+00> : vector<8x64xf32>
    %2 = tpu.matmul %0, %1, %cst {dimension_numbers = #tpu.dot_dimension_numbers<[1], [0], [0], [1], [0, 0, 1, 1], [], []>} : vector<8x64xbf16>, vector<64x64xbf16>, vector<8x64xf32> -> vector<8x64xf32>
    %c0_3 = arith.constant 0 : index
    %c0_4 = arith.constant 0 : index
    %3 = vector.load %arg3[%c0_3, %c0_4] : memref<1x64xf32, #tpu.memory_space<vmem>>, vector<1x64xf32>
    %4 = vector.broadcast %3 : vector<1x64xf32> to vector<8x64xf32>
    %5 = arith.addf %2, %4 : vector<8x64xf32>
    %cst_5 = arith.constant 0.000000e+00 : f32
    %6 = vector.broadcast %cst_5 : f32 to vector<8x64xf32>
    %7 = arith.maximumf %5, %6 : vector<8x64xf32>
    %8 = arith.truncf %7 : vector<8x64xf32> to vector<8x64xbf16>
    %c0_6 = arith.constant 0 : index
    %c0_7 = arith.constant 0 : index
    %9 = vector.load %arg4[%c0_6, %c0_7] : memref<8x64xbf16, #tpu.memory_space<vmem>>, vector<8x64xbf16>
    tpu.vector_store %arg4[%c0_6, %c0_7], %8 {strides = array<i32>} : memref<8x64xbf16, #tpu.memory_space<vmem>>, vector<8x64xbf16>,
    return
  }
  func.func @transform_0(%arg0: i32) -> (i32, i32) {
    %c0_i32 = arith.constant 0 : i32
    %c0_i32_0 = arith.constant 0 : i32
    return %arg0, %c0_i32 : i32, i32
  }
  func.func @transform_1(%arg0: i32) -> (i32, i32) {
    %c0_i32 = arith.constant 0 : i32
    %c0_i32_0 = arith.constant 0 : i32
    %c0_i32_1 = arith.constant 0 : i32
    return %c0_i32, %c0_i32_0 : i32, i32
  }
  func.func @transform_2(%arg0: i32) -> (i32, i32) {
    %c0_i32 = arith.constant 0 : i32
    %c0_i32_0 = arith.constant 0 : i32
    %c0_i32_1 = arith.constant 0 : i32
    return %c0_i32, %c0_i32_0 : i32, i32
  }
  func.func @transform_3(%arg0: i32) -> (i32, i32) {
    %c0_i32 = arith.constant 0 : i32
    %c0_i32_0 = arith.constant 0 : i32
    return %arg0, %c0_i32 : i32, i32
  }
}

module attributes {stable_mosaic.version = 11 : i64} {
  func.func @_conv_pool_kernel(%arg0: i32, %arg1: memref<4x8x288xbf16, #tpu.memory_space<vmem>>, %arg2: memref<288x64xbf16, #tpu.memory_space<vmem>>, %arg3: memref<1x64xf32, #tpu.memory_space<vmem>>, %arg4: memref<8x64xbf16, #tpu.memory_space<vmem>>) attributes {dimension_semantics = [#tpu.dimension_semantics<parallel>], iteration_bounds = array<i64: 1>, scalar_prefetch = 0 : i64, scratch_operands = 0 : i64, tpu.core_type = #tpu.core_type<tc>, window_params = [{transform_indices = @transform_0, window_bounds = array<i64: 4, 8, 288>}, {pipeline_mode = #tpu.pipeline_mode<synchronous>, transform_indices = @transform_1, window_bounds = array<i64: 288, 64>}, {pipeline_mode = #tpu.pipeline_mode<synchronous>, transform_indices = @transform_2, window_bounds = array<i64: 1, 64>}, {transform_indices = @transform_3, window_bounds = array<i64: 8, 64>}]} {
    %c0 = arith.constant 0 : index
    %c0_0 = arith.constant 0 : index
    %0 = vector.load %arg2[%c0, %c0_0] : memref<288x64xbf16, #tpu.memory_space<vmem>>, vector<288x64xbf16>
    %c0_1 = arith.constant 0 : index
    %c0_2 = arith.constant 0 : index
    %c0_3 = arith.constant 0 : index
    %1 = vector.load %arg1[%c0_1, %c0_2, %c0_3] : memref<4x8x288xbf16, #tpu.memory_space<vmem>>, vector<1x8x288xbf16>
    %2 = vector.shape_cast %1 : vector<1x8x288xbf16> to vector<8x288xbf16>
    %cst = arith.constant dense<0.000000e+00> : vector<8x64xf32>
    %3 = tpu.matmul %2, %0, %cst {dimension_numbers = #tpu.dot_dimension_numbers<[1], [0], [0], [1], [0, 0, 1, 1], [], []>} : vector<8x288xbf16>, vector<288x64xbf16>, vector<8x64xf32> -> vector<8x64xf32>
    %c1 = arith.constant 1 : index
    %c0_4 = arith.constant 0 : index
    %c0_5 = arith.constant 0 : index
    %4 = vector.load %arg1[%c1, %c0_4, %c0_5] : memref<4x8x288xbf16, #tpu.memory_space<vmem>>, vector<1x8x288xbf16>
    %5 = vector.shape_cast %4 : vector<1x8x288xbf16> to vector<8x288xbf16>
    %cst_6 = arith.constant dense<0.000000e+00> : vector<8x64xf32>
    %6 = tpu.matmul %5, %0, %cst_6 {dimension_numbers = #tpu.dot_dimension_numbers<[1], [0], [0], [1], [0, 0, 1, 1], [], []>} : vector<8x288xbf16>, vector<288x64xbf16>, vector<8x64xf32> -> vector<8x64xf32>
    %7 = arith.maximumf %3, %6 : vector<8x64xf32>
    %c2 = arith.constant 2 : index
    %c0_7 = arith.constant 0 : index
    %c0_8 = arith.constant 0 : index
    %8 = vector.load %arg1[%c2, %c0_7, %c0_8] : memref<4x8x288xbf16, #tpu.memory_space<vmem>>, vector<1x8x288xbf16>
    %9 = vector.shape_cast %8 : vector<1x8x288xbf16> to vector<8x288xbf16>
    %cst_9 = arith.constant dense<0.000000e+00> : vector<8x64xf32>
    %10 = tpu.matmul %9, %0, %cst_9 {dimension_numbers = #tpu.dot_dimension_numbers<[1], [0], [0], [1], [0, 0, 1, 1], [], []>} : vector<8x288xbf16>, vector<288x64xbf16>, vector<8x64xf32> -> vector<8x64xf32>
    %11 = arith.maximumf %7, %10 : vector<8x64xf32>
    %c3 = arith.constant 3 : index
    %c0_10 = arith.constant 0 : index
    %c0_11 = arith.constant 0 : index
    %12 = vector.load %arg1[%c3, %c0_10, %c0_11] : memref<4x8x288xbf16, #tpu.memory_space<vmem>>, vector<1x8x288xbf16>
    %13 = vector.shape_cast %12 : vector<1x8x288xbf16> to vector<8x288xbf16>
    %cst_12 = arith.constant dense<0.000000e+00> : vector<8x64xf32>
    %14 = tpu.matmul %13, %0, %cst_12 {dimension_numbers = #tpu.dot_dimension_numbers<[1], [0], [0], [1], [0, 0, 1, 1], [], []>} : vector<8x288xbf16>, vector<288x64xbf16>, vector<8x64xf32> -> vector<8x64xf32>
    %15 = arith.maximumf %11, %14 : vector<8x64xf32>
    %c0_13 = arith.constant 0 : index
    %c0_14 = arith.constant 0 : index
    %16 = vector.load %arg3[%c0_13, %c0_14] : memref<1x64xf32, #tpu.memory_space<vmem>>, vector<1x64xf32>
    %17 = vector.broadcast %16 : vector<1x64xf32> to vector<8x64xf32>
    %18 = arith.addf %15, %17 : vector<8x64xf32>
    %cst_15 = arith.constant 0.000000e+00 : f32
    %19 = vector.broadcast %cst_15 : f32 to vector<8x64xf32>
    %20 = arith.maximumf %18, %19 : vector<8x64xf32>
    %21 = arith.truncf %20 : vector<8x64xf32> to vector<8x64xbf16>
    %c0_16 = arith.constant 0 : index
    %c0_17 = arith.constant 0 : index
    %22 = vector.load %arg4[%c0_16, %c0_17] : memref<8x64xbf16, #tpu.memory_space<vmem>>, vector<8x64xbf16>
    tpu.vector_store %arg4[%c0_16, %c0_17], %21 {strides = array<i32>} : memref<8x64xbf16, #tpu.memory_space<vmem>>, vector<8x64xbf16>,
    return
  }
  func.func @transform_0(%arg0: i32) -> (i32, i32, i32) {
    %c0_i32 = arith.constant 0 : i32
    %c0_i32_0 = arith.constant 0 : i32
    %c0_i32_1 = arith.constant 0 : i32
    return %c0_i32, %arg0, %c0_i32_0 : i32, i32, i32
  }
  func.func @transform_1(%arg0: i32) -> (i32, i32) {
    %c0_i32 = arith.constant 0 : i32
    %c0_i32_0 = arith.constant 0 : i32
    %c0_i32_1 = arith.constant 0 : i32
    return %c0_i32, %c0_i32_0 : i32, i32
  }
  func.func @transform_2(%arg0: i32) -> (i32, i32) {
    %c0_i32 = arith.constant 0 : i32
    %c0_i32_0 = arith.constant 0 : i32
    %c0_i32_1 = arith.constant 0 : i32
    return %c0_i32, %c0_i32_0 : i32, i32
  }
  func.func @transform_3(%arg0: i32) -> (i32, i32) {
    %c0_i32 = arith.constant 0 : i32
    %c0_i32_0 = arith.constant 0 : i32
    return %arg0, %c0_i32 : i32, i32
  }
}

module attributes {stable_mosaic.version = 11 : i64} {
  func.func @_mm_bias_kernel(%arg0: i32, %arg1: memref<8x256xbf16, #tpu.memory_space<vmem>>, %arg2: memref<256x128xbf16, #tpu.memory_space<vmem>>, %arg3: memref<1x128xf32, #tpu.memory_space<vmem>>, %arg4: memref<8x128xf32, #tpu.memory_space<vmem>>) attributes {dimension_semantics = [#tpu.dimension_semantics<parallel>], iteration_bounds = array<i64: 1>, scalar_prefetch = 0 : i64, scratch_operands = 0 : i64, tpu.core_type = #tpu.core_type<tc>, window_params = [{transform_indices = @transform_0, window_bounds = array<i64: 8, 256>}, {pipeline_mode = #tpu.pipeline_mode<synchronous>, transform_indices = @transform_1, window_bounds = array<i64: 256, 128>}, {pipeline_mode = #tpu.pipeline_mode<synchronous>, transform_indices = @transform_2, window_bounds = array<i64: 1, 128>}, {transform_indices = @transform_3, window_bounds = array<i64: 8, 128>}]} {
    %c0 = arith.constant 0 : index
    %c0_0 = arith.constant 0 : index
    %0 = vector.load %arg1[%c0, %c0_0] : memref<8x256xbf16, #tpu.memory_space<vmem>>, vector<8x256xbf16>
    %c0_1 = arith.constant 0 : index
    %c0_2 = arith.constant 0 : index
    %1 = vector.load %arg2[%c0_1, %c0_2] : memref<256x128xbf16, #tpu.memory_space<vmem>>, vector<256x128xbf16>
    %cst = arith.constant dense<0.000000e+00> : vector<8x128xf32>
    %2 = tpu.matmul %0, %1, %cst {dimension_numbers = #tpu.dot_dimension_numbers<[1], [0], [0], [1], [0, 0, 1, 1], [], []>} : vector<8x256xbf16>, vector<256x128xbf16>, vector<8x128xf32> -> vector<8x128xf32>
    %c0_3 = arith.constant 0 : index
    %c0_4 = arith.constant 0 : index
    %3 = vector.load %arg3[%c0_3, %c0_4] : memref<1x128xf32, #tpu.memory_space<vmem>>, vector<1x128xf32>
    %4 = vector.broadcast %3 : vector<1x128xf32> to vector<8x128xf32>
    %5 = arith.addf %2, %4 : vector<8x128xf32>
    %c0_5 = arith.constant 0 : index
    %c0_6 = arith.constant 0 : index
    %6 = vector.load %arg4[%c0_5, %c0_6] : memref<8x128xf32, #tpu.memory_space<vmem>>, vector<8x128xf32>
    tpu.vector_store %arg4[%c0_5, %c0_6], %5 {strides = array<i32>} : memref<8x128xf32, #tpu.memory_space<vmem>>, vector<8x128xf32>,
    return
  }
  func.func @transform_0(%arg0: i32) -> (i32, i32) {
    %c0_i32 = arith.constant 0 : i32
    %c0_i32_0 = arith.constant 0 : i32
    return %arg0, %c0_i32 : i32, i32
  }
  func.func @transform_1(%arg0: i32) -> (i32, i32) {
    %c0_i32 = arith.constant 0 : i32
    %c0_i32_0 = arith.constant 0 : i32
    %c0_i32_1 = arith.constant 0 : i32
    return %c0_i32, %c0_i32_0 : i32, i32
  }
  func.func @transform_2(%arg0: i32) -> (i32, i32) {
    %c0_i32 = arith.constant 0 : i32
    %c0_i32_0 = arith.constant 0 : i32
    %c0_i32_1 = arith.constant 0 : i32
    return %c0_i32, %c0_i32_0 : i32, i32
  }
  func.func @transform_3(%arg0: i32) -> (i32, i32) {
    %c0_i32 = arith.constant 0 : i32
    %c0_i32_0 = arith.constant 0 : i32
    return %arg0, %c0_i32 : i32, i32
  }
}

module attributes {stable_mosaic.version = 11 : i64} {
  func.func @_skip_fuse_kernel(%arg0: i32, %arg1: memref<32x32xbf16, #tpu.memory_space<vmem>>, %arg2: memref<32x32xbf16, #tpu.memory_space<vmem>>, %arg3: memref<1x32xf32, #tpu.memory_space<vmem>>, %arg4: memref<32x32xf32, #tpu.memory_space<vmem>>, %arg5: memref<32x32xbf16, #tpu.memory_space<vmem>>) attributes {dimension_semantics = [#tpu.dimension_semantics<parallel>], iteration_bounds = array<i64: 1>, scalar_prefetch = 0 : i64, scratch_operands = 0 : i64, tpu.core_type = #tpu.core_type<tc>, window_params = [{transform_indices = @transform_0, window_bounds = array<i64: 32, 32>}, {pipeline_mode = #tpu.pipeline_mode<synchronous>, transform_indices = @transform_1, window_bounds = array<i64: 32, 32>}, {pipeline_mode = #tpu.pipeline_mode<synchronous>, transform_indices = @transform_2, window_bounds = array<i64: 1, 32>}, {transform_indices = @transform_3, window_bounds = array<i64: 32, 32>}, {transform_indices = @transform_4, window_bounds = array<i64: 32, 32>}]} {
    %c0 = arith.constant 0 : index
    %c0_0 = arith.constant 0 : index
    %0 = vector.load %arg1[%c0, %c0_0] : memref<32x32xbf16, #tpu.memory_space<vmem>>, vector<32x32xbf16>
    %c0_1 = arith.constant 0 : index
    %c0_2 = arith.constant 0 : index
    %1 = vector.load %arg2[%c0_1, %c0_2] : memref<32x32xbf16, #tpu.memory_space<vmem>>, vector<32x32xbf16>
    %cst = arith.constant dense<0.000000e+00> : vector<32x32xf32>
    %2 = tpu.matmul %0, %1, %cst {dimension_numbers = #tpu.dot_dimension_numbers<[1], [0], [0], [1], [0, 0, 1, 1], [], []>} : vector<32x32xbf16>, vector<32x32xbf16>, vector<32x32xf32> -> vector<32x32xf32>
    %c0_3 = arith.constant 0 : index
    %c0_4 = arith.constant 0 : index
    %3 = vector.load %arg3[%c0_3, %c0_4] : memref<1x32xf32, #tpu.memory_space<vmem>>, vector<1x32xf32>
    %4 = vector.broadcast %3 : vector<1x32xf32> to vector<32x32xf32>
    %5 = arith.addf %2, %4 : vector<32x32xf32>
    %cst_5 = arith.constant 0.000000e+00 : f32
    %6 = vector.broadcast %cst_5 : f32 to vector<32x32xf32>
    %7 = arith.maximumf %5, %6 : vector<32x32xf32>
    %c0_6 = arith.constant 0 : index
    %c0_7 = arith.constant 0 : index
    %8 = vector.load %arg4[%c0_6, %c0_7] : memref<32x32xf32, #tpu.memory_space<vmem>>, vector<32x32xf32>
    %9 = arith.addf %7, %8 : vector<32x32xf32>
    %cst_8 = arith.constant 0.000000e+00 : f32
    %10 = vector.broadcast %cst_8 : f32 to vector<32x32xf32>
    %11 = arith.maximumf %9, %10 : vector<32x32xf32>
    %12 = arith.truncf %11 : vector<32x32xf32> to vector<32x32xbf16>
    %c0_9 = arith.constant 0 : index
    %c0_10 = arith.constant 0 : index
    %13 = vector.load %arg5[%c0_9, %c0_10] : memref<32x32xbf16, #tpu.memory_space<vmem>>, vector<32x32xbf16>
    tpu.vector_store %arg5[%c0_9, %c0_10], %12 {strides = array<i32>} : memref<32x32xbf16, #tpu.memory_space<vmem>>, vector<32x32xbf16>,
    return
  }
  func.func @transform_0(%arg0: i32) -> (i32, i32) {
    %c0_i32 = arith.constant 0 : i32
    %c0_i32_0 = arith.constant 0 : i32
    return %arg0, %c0_i32 : i32, i32
  }
  func.func @transform_1(%arg0: i32) -> (i32, i32) {
    %c0_i32 = arith.constant 0 : i32
    %c0_i32_0 = arith.constant 0 : i32
    %c0_i32_1 = arith.constant 0 : i32
    return %c0_i32, %c0_i32_0 : i32, i32
  }
  func.func @transform_2(%arg0: i32) -> (i32, i32) {
    %c0_i32 = arith.constant 0 : i32
    %c0_i32_0 = arith.constant 0 : i32
    %c0_i32_1 = arith.constant 0 : i32
    return %c0_i32, %c0_i32_0 : i32, i32
  }
  func.func @transform_3(%arg0: i32) -> (i32, i32) {
    %c0_i32 = arith.constant 0 : i32
    %c0_i32_0 = arith.constant 0 : i32
    return %arg0, %c0_i32 : i32, i32
  }
  func.func @transform_4(%arg0: i32) -> (i32, i32) {
    %c0_i32 = arith.constant 0 : i32
    %c0_i32_0 = arith.constant 0 : i32
    return %arg0, %c0_i32 : i32, i32
  }
}

module attributes {stable_mosaic.version = 11 : i64} {
  func.func @_mm_bias_kernel(%arg0: i32, %arg1: memref<32x128xbf16, #tpu.memory_space<vmem>>, %arg2: memref<128x64xbf16, #tpu.memory_space<vmem>>, %arg3: memref<1x64xf32, #tpu.memory_space<vmem>>, %arg4: memref<32x64xf32, #tpu.memory_space<vmem>>) attributes {dimension_semantics = [#tpu.dimension_semantics<parallel>], iteration_bounds = array<i64: 1>, scalar_prefetch = 0 : i64, scratch_operands = 0 : i64, tpu.core_type = #tpu.core_type<tc>, window_params = [{transform_indices = @transform_0, window_bounds = array<i64: 32, 128>}, {pipeline_mode = #tpu.pipeline_mode<synchronous>, transform_indices = @transform_1, window_bounds = array<i64: 128, 64>}, {pipeline_mode = #tpu.pipeline_mode<synchronous>, transform_indices = @transform_2, window_bounds = array<i64: 1, 64>}, {transform_indices = @transform_3, window_bounds = array<i64: 32, 64>}]} {
    %c0 = arith.constant 0 : index
    %c0_0 = arith.constant 0 : index
    %0 = vector.load %arg1[%c0, %c0_0] : memref<32x128xbf16, #tpu.memory_space<vmem>>, vector<32x128xbf16>
    %c0_1 = arith.constant 0 : index
    %c0_2 = arith.constant 0 : index
    %1 = vector.load %arg2[%c0_1, %c0_2] : memref<128x64xbf16, #tpu.memory_space<vmem>>, vector<128x64xbf16>
    %cst = arith.constant dense<0.000000e+00> : vector<32x64xf32>
    %2 = tpu.matmul %0, %1, %cst {dimension_numbers = #tpu.dot_dimension_numbers<[1], [0], [0], [1], [0, 0, 1, 1], [], []>} : vector<32x128xbf16>, vector<128x64xbf16>, vector<32x64xf32> -> vector<32x64xf32>
    %c0_3 = arith.constant 0 : index
    %c0_4 = arith.constant 0 : index
    %3 = vector.load %arg3[%c0_3, %c0_4] : memref<1x64xf32, #tpu.memory_space<vmem>>, vector<1x64xf32>
    %4 = vector.broadcast %3 : vector<1x64xf32> to vector<32x64xf32>
    %5 = arith.addf %2, %4 : vector<32x64xf32>
    %c0_5 = arith.constant 0 : index
    %c0_6 = arith.constant 0 : index
    %6 = vector.load %arg4[%c0_5, %c0_6] : memref<32x64xf32, #tpu.memory_space<vmem>>, vector<32x64xf32>
    tpu.vector_store %arg4[%c0_5, %c0_6], %5 {strides = array<i32>} : memref<32x64xf32, #tpu.memory_space<vmem>>, vector<32x64xf32>,
    return
  }
  func.func @transform_0(%arg0: i32) -> (i32, i32) {
    %c0_i32 = arith.constant 0 : i32
    %c0_i32_0 = arith.constant 0 : i32
    return %arg0, %c0_i32 : i32, i32
  }
  func.func @transform_1(%arg0: i32) -> (i32, i32) {
    %c0_i32 = arith.constant 0 : i32
    %c0_i32_0 = arith.constant 0 : i32
    %c0_i32_1 = arith.constant 0 : i32
    return %c0_i32, %c0_i32_0 : i32, i32
  }
  func.func @transform_2(%arg0: i32) -> (i32, i32) {
    %c0_i32 = arith.constant 0 : i32
    %c0_i32_0 = arith.constant 0 : i32
    %c0_i32_1 = arith.constant 0 : i32
    return %c0_i32, %c0_i32_0 : i32, i32
  }
  func.func @transform_3(%arg0: i32) -> (i32, i32) {
    %c0_i32 = arith.constant 0 : i32
    %c0_i32_0 = arith.constant 0 : i32
    return %arg0, %c0_i32 : i32, i32
  }
}

module attributes {stable_mosaic.version = 11 : i64} {
  func.func @_skip_fuse_kernel(%arg0: i32, %arg1: memref<128x16xbf16, #tpu.memory_space<vmem>>, %arg2: memref<16x16xbf16, #tpu.memory_space<vmem>>, %arg3: memref<1x16xf32, #tpu.memory_space<vmem>>, %arg4: memref<128x16xf32, #tpu.memory_space<vmem>>, %arg5: memref<128x16xbf16, #tpu.memory_space<vmem>>) attributes {dimension_semantics = [#tpu.dimension_semantics<parallel>], iteration_bounds = array<i64: 1>, scalar_prefetch = 0 : i64, scratch_operands = 0 : i64, tpu.core_type = #tpu.core_type<tc>, window_params = [{transform_indices = @transform_0, window_bounds = array<i64: 128, 16>}, {pipeline_mode = #tpu.pipeline_mode<synchronous>, transform_indices = @transform_1, window_bounds = array<i64: 16, 16>}, {pipeline_mode = #tpu.pipeline_mode<synchronous>, transform_indices = @transform_2, window_bounds = array<i64: 1, 16>}, {transform_indices = @transform_3, window_bounds = array<i64: 128, 16>}, {transform_indices = @transform_4, window_bounds = array<i64: 128, 16>}]} {
    %c0 = arith.constant 0 : index
    %c0_0 = arith.constant 0 : index
    %0 = vector.load %arg1[%c0, %c0_0] : memref<128x16xbf16, #tpu.memory_space<vmem>>, vector<128x16xbf16>
    %c0_1 = arith.constant 0 : index
    %c0_2 = arith.constant 0 : index
    %1 = vector.load %arg2[%c0_1, %c0_2] : memref<16x16xbf16, #tpu.memory_space<vmem>>, vector<16x16xbf16>
    %cst = arith.constant dense<0.000000e+00> : vector<128x16xf32>
    %2 = tpu.matmul %0, %1, %cst {dimension_numbers = #tpu.dot_dimension_numbers<[1], [0], [0], [1], [0, 0, 1, 1], [], []>} : vector<128x16xbf16>, vector<16x16xbf16>, vector<128x16xf32> -> vector<128x16xf32>
    %c0_3 = arith.constant 0 : index
    %c0_4 = arith.constant 0 : index
    %3 = vector.load %arg3[%c0_3, %c0_4] : memref<1x16xf32, #tpu.memory_space<vmem>>, vector<1x16xf32>
    %4 = vector.broadcast %3 : vector<1x16xf32> to vector<128x16xf32>
    %5 = arith.addf %2, %4 : vector<128x16xf32>
    %cst_5 = arith.constant 0.000000e+00 : f32
    %6 = vector.broadcast %cst_5 : f32 to vector<128x16xf32>
    %7 = arith.maximumf %5, %6 : vector<128x16xf32>
    %c0_6 = arith.constant 0 : index
    %c0_7 = arith.constant 0 : index
    %8 = vector.load %arg4[%c0_6, %c0_7] : memref<128x16xf32, #tpu.memory_space<vmem>>, vector<128x16xf32>
    %9 = arith.addf %7, %8 : vector<128x16xf32>
    %cst_8 = arith.constant 0.000000e+00 : f32
    %10 = vector.broadcast %cst_8 : f32 to vector<128x16xf32>
    %11 = arith.maximumf %9, %10 : vector<128x16xf32>
    %12 = arith.truncf %11 : vector<128x16xf32> to vector<128x16xbf16>
    %c0_9 = arith.constant 0 : index
    %c0_10 = arith.constant 0 : index
    %13 = vector.load %arg5[%c0_9, %c0_10] : memref<128x16xbf16, #tpu.memory_space<vmem>>, vector<128x16xbf16>
    tpu.vector_store %arg5[%c0_9, %c0_10], %12 {strides = array<i32>} : memref<128x16xbf16, #tpu.memory_space<vmem>>, vector<128x16xbf16>,
    return
  }
  func.func @transform_0(%arg0: i32) -> (i32, i32) {
    %c0_i32 = arith.constant 0 : i32
    %c0_i32_0 = arith.constant 0 : i32
    return %arg0, %c0_i32 : i32, i32
  }
  func.func @transform_1(%arg0: i32) -> (i32, i32) {
    %c0_i32 = arith.constant 0 : i32
    %c0_i32_0 = arith.constant 0 : i32
    %c0_i32_1 = arith.constant 0 : i32
    return %c0_i32, %c0_i32_0 : i32, i32
  }
  func.func @transform_2(%arg0: i32) -> (i32, i32) {
    %c0_i32 = arith.constant 0 : i32
    %c0_i32_0 = arith.constant 0 : i32
    %c0_i32_1 = arith.constant 0 : i32
    return %c0_i32, %c0_i32_0 : i32, i32
  }
  func.func @transform_3(%arg0: i32) -> (i32, i32) {
    %c0_i32 = arith.constant 0 : i32
    %c0_i32_0 = arith.constant 0 : i32
    return %arg0, %c0_i32 : i32, i32
  }
  func.func @transform_4(%arg0: i32) -> (i32, i32) {
    %c0_i32 = arith.constant 0 : i32
    %c0_i32_0 = arith.constant 0 : i32
    return %arg0, %c0_i32 : i32, i32
  }
}

module attributes {stable_mosaic.version = 11 : i64} {
  func.func @_deconv_classifier_kernel(%arg0: i32, %arg1: memref<128x64xbf16, #tpu.memory_space<vmem>>, %arg2: memref<64x32xbf16, #tpu.memory_space<vmem>>, %arg3: memref<1x32xf32, #tpu.memory_space<vmem>>, %arg4: memref<32x4xf32, #tpu.memory_space<vmem>>, %arg5: memref<1x4xf32, #tpu.memory_space<vmem>>, %arg6: memref<128x4xf32, #tpu.memory_space<vmem>>) attributes {dimension_semantics = [#tpu.dimension_semantics<parallel>], iteration_bounds = array<i64: 1>, scalar_prefetch = 0 : i64, scratch_operands = 0 : i64, tpu.core_type = #tpu.core_type<tc>, window_params = [{transform_indices = @transform_0, window_bounds = array<i64: 128, 64>}, {pipeline_mode = #tpu.pipeline_mode<synchronous>, transform_indices = @transform_1, window_bounds = array<i64: 64, 32>}, {pipeline_mode = #tpu.pipeline_mode<synchronous>, transform_indices = @transform_2, window_bounds = array<i64: 1, 32>}, {pipeline_mode = #tpu.pipeline_mode<synchronous>, transform_indices = @transform_3, window_bounds = array<i64: 32, 4>}, {pipeline_mode = #tpu.pipeline_mode<synchronous>, transform_indices = @transform_4, window_bounds = array<i64: 1, 4>}, {transform_indices = @transform_5, window_bounds = array<i64: 128, 4>}]} {
    %c0 = arith.constant 0 : index
    %c0_0 = arith.constant 0 : index
    %0 = vector.load %arg1[%c0, %c0_0] : memref<128x64xbf16, #tpu.memory_space<vmem>>, vector<128x64xbf16>
    %c0_1 = arith.constant 0 : index
    %c0_2 = arith.constant 0 : index
    %1 = vector.load %arg2[%c0_1, %c0_2] : memref<64x32xbf16, #tpu.memory_space<vmem>>, vector<64x32xbf16>
    %cst = arith.constant dense<0.000000e+00> : vector<128x32xf32>
    %2 = tpu.matmul %0, %1, %cst {dimension_numbers = #tpu.dot_dimension_numbers<[1], [0], [0], [1], [0, 0, 1, 1], [], []>} : vector<128x64xbf16>, vector<64x32xbf16>, vector<128x32xf32> -> vector<128x32xf32>
    %c0_3 = arith.constant 0 : index
    %c0_4 = arith.constant 0 : index
    %3 = vector.load %arg3[%c0_3, %c0_4] : memref<1x32xf32, #tpu.memory_space<vmem>>, vector<1x32xf32>
    %4 = vector.broadcast %3 : vector<1x32xf32> to vector<128x32xf32>
    %5 = arith.addf %2, %4 : vector<128x32xf32>
    %cst_5 = arith.constant 0.000000e+00 : f32
    %6 = vector.broadcast %cst_5 : f32 to vector<128x32xf32>
    %7 = arith.maximumf %5, %6 : vector<128x32xf32>
    %c0_6 = arith.constant 0 : index
    %c0_7 = arith.constant 0 : index
    %8 = vector.load %arg4[%c0_6, %c0_7] : memref<32x4xf32, #tpu.memory_space<vmem>>, vector<32x4xf32>
    %cst_8 = arith.constant dense<0.000000e+00> : vector<128x4xf32>
    %9 = tpu.matmul %7, %8, %cst_8 {dimension_numbers = #tpu.dot_dimension_numbers<[1], [0], [0], [1], [0, 0, 1, 1], [], []>} : vector<128x32xf32>, vector<32x4xf32>, vector<128x4xf32> -> vector<128x4xf32>
    %c0_9 = arith.constant 0 : index
    %c0_10 = arith.constant 0 : index
    %10 = vector.load %arg5[%c0_9, %c0_10] : memref<1x4xf32, #tpu.memory_space<vmem>>, vector<1x4xf32>
    %11 = vector.broadcast %10 : vector<1x4xf32> to vector<128x4xf32>
    %12 = arith.addf %9, %11 : vector<128x4xf32>
    %c0_11 = arith.constant 0 : index
    %c0_12 = arith.constant 0 : index
    %13 = vector.load %arg6[%c0_11, %c0_12] : memref<128x4xf32, #tpu.memory_space<vmem>>, vector<128x4xf32>
    tpu.vector_store %arg6[%c0_11, %c0_12], %12 {strides = array<i32>} : memref<128x4xf32, #tpu.memory_space<vmem>>, vector<128x4xf32>,
    return
  }
  func.func @transform_0(%arg0: i32) -> (i32, i32) {
    %c0_i32 = arith.constant 0 : i32
    %c0_i32_0 = arith.constant 0 : i32
    return %arg0, %c0_i32 : i32, i32
  }
  func.func @transform_1(%arg0: i32) -> (i32, i32) {
    %c0_i32 = arith.constant 0 : i32
    %c0_i32_0 = arith.constant 0 : i32
    %c0_i32_1 = arith.constant 0 : i32
    return %c0_i32, %c0_i32_0 : i32, i32
  }
  func.func @transform_2(%arg0: i32) -> (i32, i32) {
    %c0_i32 = arith.constant 0 : i32
    %c0_i32_0 = arith.constant 0 : i32
    %c0_i32_1 = arith.constant 0 : i32
    return %c0_i32, %c0_i32_0 : i32, i32
  }
  func.func @transform_3(%arg0: i32) -> (i32, i32) {
    %c0_i32 = arith.constant 0 : i32
    %c0_i32_0 = arith.constant 0 : i32
    %c0_i32_1 = arith.constant 0 : i32
    return %c0_i32, %c0_i32_0 : i32, i32
  }
  func.func @transform_4(%arg0: i32) -> (i32, i32) {
    %c0_i32 = arith.constant 0 : i32
    %c0_i32_0 = arith.constant 0 : i32
    %c0_i32_1 = arith.constant 0 : i32
    return %c0_i32, %c0_i32_0 : i32, i32
  }
  func.func @transform_5(%arg0: i32) -> (i32, i32) {
    %c0_i32 = arith.constant 0 : i32
    %c0_i32_0 = arith.constant 0 : i32
    return %arg0, %c0_i32 : i32, i32
  }
}

</mosaic_0001>

<bundles_post_ra>
// kernel: endewithpooling_forward.9
= control target key start
LH: loop header
LB: loop body
LE: loop exit
PB: predicated region body
PF: predicated region fallthrough
CT: control target
= control target key end

     0   :  { %vm91_vm0 = vcmask 293888   ;;  %vm116_vm1 = vcmask 1041408   ;;  %vm902_vm2 = vcmask 125952   ;;  %s1597_s1 = inlined_call_operand.vmem [shape: bf16[36,16], index: 1, kind: input, shape index: {}]   ;;  %s1598_s0 = inlined_call_operand.vmem [shape: bf16[4,128,36], index: 0, kind: input, shape index: {}]   ;;  %s1599_s2 = inlined_call_operand.vmem [shape: f32[1,16], index: 2, kind: input, shape index: {}]   ;;  %s1600_s3 = inlined_call_operand.vmem [shape: bf16[128,16], index: 3, kind: output, shape index: {}]  }
   0x1   :  { %v1207_v0 = vld [vmem:[%s1597_s1] sm:$0xff]   ;;  %v1208_v1 = vld [vmem:[%s1597_s1 + $0x8] sm:$0xff]   ;;  %v1209_v2 = vld [vmem:[%s1597_s1 + $0x10] ss:$0 sps:$4 sm:$0x33]  }
   0x2   :  { %1115 = vmatprep.subr.bf16.mxu0 %v1207_v0  ;;  %1137 = vmatprep.subr.bf16.mxu1 %v1207_v0  ;;  %v1210_v3 = vld [vmem:[%s1598_s0] sm:$0xff]   ;;  %v118_v5 = vsel %vm116_vm1, %v1209_v2, 0  ;;  %v1212_v6 = vld [vmem:[%s1598_s0 + $0x8] sm:$0xff]   ;;  %v1214_v8 = vld [vmem:[%s1598_s0 + $0x10] sm:$0xff]  }
   0x3   :  { %1116 = vmatpush3.bf16.msra.mxu0 %v1207_v0  ;;  %1138 = vmatpush3.bf16.msra.mxu1 %v1207_v0  ;;  %v1211_v4 = vld [vmem:[%s1598_s0 + $0x40] sm:$0xff]   ;;  %v1213_v7 = vld [vmem:[%s1598_s0 + $0x48] sm:$0xff]   ;;  %v1215_v9 = vld [vmem:[%s1598_s0 + $0x50] sm:$0xff]  }
   0x4   :  { %1117 = vmatprep.subr.bf16.mxu0 %v1208_v1  ;;  %1139 = vmatprep.subr.bf16.mxu1 %v1208_v1  ;;  %v1216_v10 = vld [vmem:[%s1598_s0 + $0x18] sm:$0xff]   ;;  %v1218_v12 = vld [vmem:[%s1598_s0 + $0x20] sm:$0xff]   ;;  %v1220_v14 = vld [vmem:[%s1598_s0 + $0x28] sm:$0xff]  }
   0x5   :  { %1121 = vmatprep.mubr.msk.bf16.mxu0 %vm91_vm0, %v1210_v3  ;;  %1143 = vmatprep.mubr.msk.bf16.mxu1 %vm91_vm0, %v1211_v4  ;;  %v1217_v11 = vld [vmem:[%s1598_s0 + $0x58] sm:$0xff]   ;;  %v1219_v13 = vld [vmem:[%s1598_s0 + $0x60] sm:$0xff]   ;;  %v1221_v15 = vld [vmem:[%s1598_s0 + $0x68] sm:$0xff]  }
   0x6   :  { %v1222_v16 = vld [vmem:[%s1598_s0 + $0x30] sm:$0xff]   ;;  %v1224_v18 = vld [vmem:[%s1598_s0 + $0x38] sm:$0xff]   ;;  %v1226_v20 = vld [vmem:[%s1598_s0 + $0x80] sm:$0xff]  }
   0x7   :  { %1118 = vmatpush3.bf16.msra.mxu0 %v1208_v1  ;;  %1140 = vmatpush3.bf16.msra.mxu1 %v1208_v1  ;;  %v1223_v17 = vld [vmem:[%s1598_s0 + $0x70] sm:$0xff]   ;;  %v1225_v19 = vld [vmem:[%s1598_s0 + $0x78] sm:$0xff]   ;;  %v1227_v21 = vld [vmem:[%s1598_s0 + $0xc0] sm:$0xff]  }
   0x8   :  { %1203 = vmatprep.subr.msk.bf16.mxu0 %vm116_vm1, %v1209_v2  ;;  %1204 = vmatprep.subr.msk.bf16.mxu1 %vm116_vm1, %v1209_v2  ;;  %v1228_v22 = vld [vmem:[%s1598_s0 + $0x88] sm:$0xff]   ;;  %v1230_v24 = vld [vmem:[%s1598_s0 + $0x90] sm:$0xff]   ;;  %v1232_v26 = vld [vmem:[%s1598_s0 + $0x98] sm:$0xff]  }
   0x9   :  { %v1229_v23 = vld [vmem:[%s1598_s0 + $0xc8] sm:$0xff]   ;;  %v1231_v25 = vld [vmem:[%s1598_s0 + $0xd0] sm:$0xff]   ;;  %v1233_v27 = vld [vmem:[%s1598_s0 + $0xd8] sm:$0xff]  }
   0xa   :  { %v1234_v28 = vld [vmem:[%s1598_s0 + $0xa0] sm:$0xff]   ;;  %v1236_v30 = vld [vmem:[%s1598_s0 + $0xa8] sm:$0xff]   ;;  %v1238_v32 = vld [vmem:[%s1598_s0 + $0xb0] sm:$0xff]  }
   0xb   :  { %1120 = vmatpush3.bf16.msra.mxu0 %v118_v5  ;;  %1142 = vmatpush3.bf16.msra.mxu1 %v118_v5  ;;  %v1235_v29 = vld [vmem:[%s1598_s0 + $0xe0] sm:$0xff]   ;;  %v1237_v31 = vld [vmem:[%s1598_s0 + $0xe8] sm:$0xff]   ;;  %v1239_v33 = vld [vmem:[%s1598_s0 + $0xf0] sm:$0xff]  }
   0xc   :  { %1159 = vmatprep.subr.bf16.mxu0 %v1207_v0  ;;  %1181 = vmatprep.subr.bf16.mxu1 %v1207_v0  ;;  %v1240_v34 = vld [vmem:[%s1598_s0 + $0xb8] sm:$0xff]  }
   0xd   :  { %v1241_v35 = vld [vmem:[%s1598_s0 + $0xf8] sm:$0xff]  }
   0xe   :  { %1122 = vmatmul.mubr.msk.bf16.vlgmr.msra.gmra.mrb[0].mxu0 %vm91_vm0, %v1212_v6  ;;  %1144 = vmatmul.mubr.msk.bf16.vlgmr.msra.gmra.mrb[0].mxu1 %vm91_vm0, %v1213_v7 }
   0xf   :  { %1160 = vmatpush3.bf16.msra.mxu0 %v1207_v0  ;;  %1182 = vmatpush3.bf16.msra.mxu1 %v1207_v0 }
  0x10   :  { %1125 = vmatprep.mubr.msk.bf16.mxu0 %vm91_vm0, %v1214_v8  ;;  %1147 = vmatprep.mubr.msk.bf16.mxu1 %vm91_vm0, %v1215_v9 }
  0x11   :  { %1161 = vmatprep.subr.bf16.mxu0 %v1208_v1  ;;  %1183 = vmatprep.subr.bf16.mxu1 %v1208_v1 }
  0x13   :  { %1162 = vmatpush3.bf16.msra.mxu0 %v1208_v1  ;;  %1184 = vmatpush3.bf16.msra.mxu1 %v1208_v1 }
  0x14   :  { %1205 = vmatprep.subr.msk.bf16.mxu0 %vm116_vm1, %v1209_v2  ;;  %1206 = vmatprep.subr.msk.bf16.mxu1 %vm116_vm1, %v1209_v2 }
  0x16   :  { %1126 = vmatmul.mubr.msk.bf16.gmra.mrb[4].mxu0 %vm91_vm0, %v1216_v10  ;;  %1148 = vmatmul.mubr.msk.bf16.gmra.mrb[4].mxu1 %vm91_vm0, %v1217_v11 }
  0x17   :  { %1129 = vmatprep.mubr.msk.bf16.mxu0 %vm91_vm0, %v1218_v12  ;;  %1151 = vmatprep.mubr.msk.bf16.mxu1 %vm91_vm0, %v1219_v13 }
  0x18   :  { %1164 = vmatpush3.bf16.msra.mxu0 %v118_v5  ;;  %1186 = vmatpush3.bf16.msra.mxu1 %v118_v5 }
  0x1e   :  { %1130 = vmatmul.mubr.msk.bf16.gmra.mrb[8].mxu0 %vm91_vm0, %v1220_v14  ;;  %1152 = vmatmul.mubr.msk.bf16.gmra.mrb[8].mxu1 %vm91_vm0, %v1221_v15 }
  0x1f   :  { %1133 = vmatprep.mubr.msk.bf16.mxu0 %vm91_vm0, %v1222_v16  ;;  %1155 = vmatprep.mubr.msk.bf16.mxu1 %vm91_vm0, %v1223_v17 }
  0x26   :  { %1134 = vmatmul.mubr.msk.bf16.gmra.mrb[12].mxu0 %vm91_vm0, %v1224_v18  ;;  %1156 = vmatmul.mubr.msk.bf16.gmra.mrb[12].mxu1 %vm91_vm0, %v1225_v19 }
  0x27   :  { %1165 = vmatprep.mubr.msk.bf16.mxu0 %vm91_vm0, %v1226_v20  ;;  %1187 = vmatprep.mubr.msk.bf16.mxu1 %vm91_vm0, %v1227_v21 }
  0x2e   :  { %1166 = vmatmul.mubr.msk.bf16.vlgmr.msra.gmra.mrb[16].mxu0 %vm91_vm0, %v1228_v22  ;;  %1188 = vmatmul.mubr.msk.bf16.vlgmr.msra.gmra.mrb[16].mxu1 %vm91_vm0, %v1229_v23 }
  0x2f   :  { %1169 = vmatprep.mubr.msk.bf16.mxu0 %vm91_vm0, %v1230_v24  ;;  %1191 = vmatprep.mubr.msk.bf16.mxu1 %vm91_vm0, %v1231_v25  ;;  %v1479_v25 = vld [vmem:[%s1599_s2] ss:$0 sm:$0xff] }
  0x36   :  { %1170 = vmatmul.mubr.msk.bf16.gmra.mrb[20].mxu0 %vm91_vm0, %v1232_v26  ;;  %1192 = vmatmul.mubr.msk.bf16.gmra.mrb[20].mxu1 %vm91_vm0, %v1233_v27 }
  0x37   :  { %1173 = vmatprep.mubr.msk.bf16.mxu0 %vm91_vm0, %v1234_v28  ;;  %1195 = vmatprep.mubr.msk.bf16.mxu1 %vm91_vm0, %v1235_v29 }
  0x3e   :  { %1174 = vmatmul.mubr.msk.bf16.gmra.mrb[24].mxu0 %vm91_vm0, %v1236_v30  ;;  %1196 = vmatmul.mubr.msk.bf16.gmra.mrb[24].mxu1 %vm91_vm0, %v1237_v31 }
  0x3f   :  { %1177 = vmatprep.mubr.msk.bf16.mxu0 %vm91_vm0, %v1238_v32  ;;  %1199 = vmatprep.mubr.msk.bf16.mxu1 %vm91_vm0, %v1239_v33 }
  0x46   :  { %1178 = vmatmul.mubr.msk.bf16.gmra.mrb[28].mxu0 %vm91_vm0, %v1240_v34  ;;  %1200 = vmatmul.mubr.msk.bf16.gmra.mrb[28].mxu1 %vm91_vm0, %v1241_v35 }
  0xe1   :  { %v1123_v36 = vpop.f32.mrb[0].mxu0  ;;  %v1145_v37 = vpop.f32.mrb[0].mxu1 }
  0xe2   :  { %v397_v38 = vmax.f32 %v1123_v36, %v1145_v37  ;;  %v154_v39 = vpop.f32.mrb[1].mxu0  ;;  %v332_v40 = vpop.f32.mrb[1].mxu1 }
  0xe3   :  { %v395_v41 = vmax.f32 %v154_v39, %v332_v40  ;;  %v1124_v42 = vpop.f32.mrb[2].mxu0  ;;  %v1146_v43 = vpop.f32.mrb[2].mxu1 }
  0xe4   :  { %v398_v44 = vmax.f32 %v1124_v42, %v1146_v43  ;;  %v157_v45 = vpop.f32.mrb[3].mxu0  ;;  %v335_v46 = vpop.f32.mrb[3].mxu1 }
  0xe5   :  { %v396_v47 = vmax.f32 %v157_v45, %v335_v46 }
  0xe9   :  { %v1404_v48 = vpop.f32.mrb[4].mxu0  ;;  %v1406_v49 = vpop.f32.mrb[4].mxu1 }
  0xea   :  { %v401_v50 = vmax.f32 %v1404_v48, %v1406_v49  ;;  %v1410_v51 = vpop.f32.mrb[5].mxu0  ;;  %v1412_v52 = vpop.f32.mrb[5].mxu1 }
  0xeb   :  { %v399_v53 = vmax.f32 %v1410_v51, %v1412_v52  ;;  %v1416_v54 = vpop.f32.mrb[6].mxu0  ;;  %v1418_v55 = vpop.f32.mrb[6].mxu1 }
  0xec   :  { %v402_v56 = vmax.f32 %v1416_v54, %v1418_v55  ;;  %v1422_v57 = vpop.f32.mrb[7].mxu0  ;;  %v1424_v58 = vpop.f32.mrb[7].mxu1 }
  0xed   :  { %v400_v59 = vmax.f32 %v1422_v57, %v1424_v58 }
  0xf1   :  { %v1428_v60 = vpop.f32.mrb[8].mxu0  ;;  %v1430_v61 = vpop.f32.mrb[8].mxu1 }
  0xf2   :  { %v405_v62 = vmax.f32 %v1428_v60, %v1430_v61  ;;  %v1434_v63 = vpop.f32.mrb[9].mxu0  ;;  %v1436_v0 = vpop.f32.mrb[9].mxu1 }
  0xf3   :  { %v403_v1 = vmax.f32 %v1434_v63, %v1436_v0  ;;  %v1440_v2 = vpop.f32.mrb[10].mxu0  ;;  %v1442_v3 = vpop.f32.mrb[10].mxu1 }
  0xf4   :  { %v406_v4 = vmax.f32 %v1440_v2, %v1442_v3  ;;  %v1446_v5 = vpop.f32.mrb[11].mxu0  ;;  %v1448_v6 = vpop.f32.mrb[11].mxu1 }
  0xf5   :  { %v404_v7 = vmax.f32 %v1446_v5, %v1448_v6 }
  0xf9   :  { %v1452_v8 = vpop.f32.mrb[12].mxu0  ;;  %v1454_v9 = vpop.f32.mrb[12].mxu1 }
  0xfa   :  { %v409_v10 = vmax.f32 %v1452_v8, %v1454_v9  ;;  %v1458_v11 = vpop.f32.mrb[13].mxu0  ;;  %v1460_v12 = vpop.f32.mrb[13].mxu1 }
  0xfb   :  { %v407_v13 = vmax.f32 %v1458_v11, %v1460_v12  ;;  %v1464_v14 = vpop.f32.mrb[14].mxu0  ;;  %v1466_v15 = vpop.f32.mrb[14].mxu1 }
  0xfc   :  { %v410_v16 = vmax.f32 %v1464_v14, %v1466_v15  ;;  %v1470_v17 = vpop.f32.mrb[15].mxu0  ;;  %v1472_v18 = vpop.f32.mrb[15].mxu1 }
  0xfd   :  { %v408_v19 = vmax.f32 %v1470_v17, %v1472_v18 }
 0x101   :  { %v1167_v20 = vpop.f32.mrb[16].mxu0  ;;  %v1189_v21 = vpop.f32.mrb[16].mxu1 }
 0x102   :  { %v591_v22 = vmax.f32 %v397_v38, %v1167_v20  ;;  %v526_v23 = vpop.f32.mrb[17].mxu0  ;;  %v720_v24 = vpop.f32.mrb[17].mxu1 }
 0x103   :  { %v589_v26 = vmax.f32 %v395_v41, %v526_v23  ;;  %v1168_v27 = vpop.f32.mrb[18].mxu0  ;;  %v1190_v28 = vpop.f32.mrb[18].mxu1 }
 0x104   :  { %v785_v29 = vmax.f32 %v591_v22, %v1189_v21  ;;  %v592_v30 = vmax.f32 %v398_v44, %v1168_v27  ;;  %v529_v31 = vpop.f32.mrb[19].mxu0  ;;  %v723_v32 = vpop.f32.mrb[19].mxu1 }
 0x105   :  { %v783_v33 = vmax.f32 %v589_v26, %v720_v24  ;;  %v590_v34 = vmax.f32 %v396_v47, %v529_v31 }
 0x106   :  { %v808_v35 = vadd.f32 %v1479_v25, %v785_v29  ;;  %v786_v36 = vmax.f32 %v592_v30, %v1190_v28 }
 0x107   :  { %v806_v37 = vadd.f32 %v1479_v25, %v783_v33  ;;  %v784_v38 = vmax.f32 %v590_v34, %v723_v32 }
 0x108   :  { %v824_v39 = vmax.f32 %v808_v35, 0.0  ;;  %v809_v40 = vadd.f32 %v1479_v25, %v786_v36 }
 0x109   :  { %v822_v42 = vmax.f32 %v806_v37, 0.0  ;;  %v807_v41 = vadd.f32 %v1479_v25, %v784_v38  ;;  %v1171_v43 = vpop.f32.mrb[20].mxu0  ;;  %v1193_v45 = vpop.f32.mrb[20].mxu1 }
 0x10a   :  { %v1057_v44 = vpack.c.bf16 %v824_v39, %v824_v39  ;;  %v825_v46 = vmax.f32 %v809_v40, 0.0  ;;  %v595_v47 = vmax.f32 %v401_v50, %v1171_v43  ;;  %v542_v20 = vpop.f32.mrb[21].mxu0  ;;  %v736_v21 = vpop.f32.mrb[21].mxu1 }
 0x10b   :  { %v1055_v22 = vpack.c.bf16 %v822_v42, %v822_v42  ;;  %v823_v23 = vmax.f32 %v807_v41, 0.0  ;;  %v593_v24 = vmax.f32 %v399_v53, %v542_v20  ;;  %v1172_v26 = vpop.f32.mrb[22].mxu0  ;;  %v1194_v27 = vpop.f32.mrb[22].mxu1 }
 0x10c   :  { %905 = vst.msk [vmem:[%s1600_s3 + $0x8] sm:$0xf] %vm902_vm2, %v1057_v44  ;;  %v1058_v28 = vpack.c.bf16 %v825_v46, %v825_v46  ;;  %v789_v29 = vmax.f32 %v595_v47, %v1193_v45  ;;  %v596_v48 = vmax.f32 %v402_v56, %v1172_v26  ;;  %v545_v49 = vpop.f32.mrb[23].mxu0  ;;  %v739_v50 = vpop.f32.mrb[23].mxu1 }
 0x10d   :  { %903 = vst.msk [vmem:[%s1600_s3] sm:$0xf] %vm902_vm2, %v1055_v22  ;;  %v1056_v51 = vpack.c.bf16 %v823_v23, %v823_v23  ;;  %v787_v52 = vmax.f32 %v593_v24, %v736_v21  ;;  %v594_v53 = vmax.f32 %v400_v59, %v545_v49 }
 0x10e   :  { %906 = vst.msk [vmem:[%s1600_s3 + $0xc] sm:$0xf] %vm902_vm2, %v1058_v28  ;;  %v812_v54 = vadd.f32 %v1479_v25, %v789_v29  ;;  %v790_v55 = vmax.f32 %v596_v48, %v1194_v27 }
 0x10f   :  { %904 = vst.msk [vmem:[%s1600_s3 + $0x4] sm:$0xf] %vm902_vm2, %v1056_v51  ;;  %v810_v56 = vadd.f32 %v1479_v25, %v787_v52  ;;  %v788_v30 = vmax.f32 %v594_v53, %v739_v50 }
 0x110   :  { %v828_v31 = vmax.f32 %v812_v54, 0.0  ;;  %v813_v57 = vadd.f32 %v1479_v25, %v790_v55 }
 0x111   :  { %v826_v58 = vmax.f32 %v810_v56, 0.0  ;;  %v811_v59 = vadd.f32 %v1479_v25, %v788_v30  ;;  %v1175_v32 = vpop.f32.mrb[24].mxu0  ;;  %v1197_v33 = vpop.f32.mrb[24].mxu1 }
 0x112   :  { %v1061_v34 = vpack.c.bf16 %v828_v31, %v828_v31  ;;  %v829_v35 = vmax.f32 %v813_v57, 0.0  ;;  %v599_v36 = vmax.f32 %v405_v62, %v1175_v32  ;;  %v558_v37 = vpop.f32.mrb[25].mxu0  ;;  %v752_v38 = vpop.f32.mrb[25].mxu1 }
 0x113   :  { %v1059_v39 = vpack.c.bf16 %v826_v58, %v826_v58  ;;  %v827_v40 = vmax.f32 %v811_v59, 0.0  ;;  %v597_v42 = vmax.f32 %v403_v1, %v558_v37  ;;  %v1176_v41 = vpop.f32.mrb[26].mxu0  ;;  %v1198_v43 = vpop.f32.mrb[26].mxu1 }
 0x114   :  { %909 = vst.msk [vmem:[%s1600_s3 + $0x18] sm:$0xf] %vm902_vm2, %v1061_v34  ;;  %v1062_v45 = vpack.c.bf16 %v829_v35, %v829_v35  ;;  %v793_v44 = vmax.f32 %v599_v36, %v1197_v33  ;;  %v600_v60 = vmax.f32 %v406_v4, %v1176_v41  ;;  %v561_v61 = vpop.f32.mrb[27].mxu0  ;;  %v755_v62 = vpop.f32.mrb[27].mxu1 }
 0x115   :  { %907 = vst.msk [vmem:[%s1600_s3 + $0x10] sm:$0xf] %vm902_vm2, %v1059_v39  ;;  %v1060_v63 = vpack.c.bf16 %v827_v40, %v827_v40  ;;  %v791_v0 = vmax.f32 %v597_v42, %v752_v38  ;;  %v598_v1 = vmax.f32 %v404_v7, %v561_v61 }
 0x116   :  { %910 = vst.msk [vmem:[%s1600_s3 + $0x1c] sm:$0xf] %vm902_vm2, %v1062_v45  ;;  %v816_v2 = vadd.f32 %v1479_v25, %v793_v44  ;;  %v794_v3 = vmax.f32 %v600_v60, %v1198_v43 }
 0x117   :  { %908 = vst.msk [vmem:[%s1600_s3 + $0x14] sm:$0xf] %vm902_vm2, %v1060_v63  ;;  %v814_v4 = vadd.f32 %v1479_v25, %v791_v0  ;;  %v792_v46 = vmax.f32 %v598_v1, %v755_v62 }
 0x118   :  { %v832_v47 = vmax.f32 %v816_v2, 0.0  ;;  %v817_v5 = vadd.f32 %v1479_v25, %v794_v3 }
 0x119   :  { %v830_v6 = vmax.f32 %v814_v4, 0.0  ;;  %v815_v7 = vadd.f32 %v1479_v25, %v792_v46  ;;  %v1179_v20 = vpop.f32.mrb[28].mxu0  ;;  %v1201_v21 = vpop.f32.mrb[28].mxu1 }
 0x11a   :  { %v1065_v22 = vpack.c.bf16 %v832_v47, %v832_v47  ;;  %v833_v23 = vmax.f32 %v817_v5, 0.0  ;;  %v603_v24 = vmax.f32 %v409_v10, %v1179_v20  ;;  %v574_v26 = vpop.f32.mrb[29].mxu0  ;;  %v768_v27 = vpop.f32.mrb[29].mxu1 }
 0x11b   :  { %v1063_v28 = vpack.c.bf16 %v830_v6, %v830_v6  ;;  %v831_v29 = vmax.f32 %v815_v7, 0.0  ;;  %v601_v48 = vmax.f32 %v407_v13, %v574_v26  ;;  %v1180_v49 = vpop.f32.mrb[30].mxu0  ;;  %v1202_v50 = vpop.f32.mrb[30].mxu1 }
 0x11c   :  { %913 = vst.msk [vmem:[%s1600_s3 + $0x28] sm:$0xf] %vm902_vm2, %v1065_v22  ;;  %v1066_v51 = vpack.c.bf16 %v833_v23, %v833_v23  ;;  %v797_v52 = vmax.f32 %v603_v24, %v1201_v21  ;;  %v604_v8 = vmax.f32 %v410_v16, %v1180_v49  ;;  %v577_v9 = vpop.f32.mrb[31].mxu0  ;;  %v771_v10 = vpop.f32.mrb[31].mxu1 }
 0x11d   :  { %911 = vst.msk [vmem:[%s1600_s3 + $0x20] sm:$0xf] %vm902_vm2, %v1063_v28  ;;  %v1064_v11 = vpack.c.bf16 %v831_v29, %v831_v29  ;;  %v795_v12 = vmax.f32 %v601_v48, %v768_v27  ;;  %v602_v13 = vmax.f32 %v408_v19, %v577_v9 }
 0x11e   :  { %914 = vst.msk [vmem:[%s1600_s3 + $0x2c] sm:$0xf] %vm902_vm2, %v1066_v51  ;;  %v820_v14 = vadd.f32 %v1479_v25, %v797_v52  ;;  %v798_v15 = vmax.f32 %v604_v8, %v1202_v50 }
 0x11f   :  { %912 = vst.msk [vmem:[%s1600_s3 + $0x24] sm:$0xf] %vm902_vm2, %v1064_v11  ;;  %v818_v16 = vadd.f32 %v1479_v25, %v795_v12  ;;  %v796_v53 = vmax.f32 %v602_v13, %v771_v10 }
 0x120   :  { %v836_v54 = vmax.f32 %v820_v14, 0.0  ;;  %v821_v17 = vadd.f32 %v1479_v25, %v798_v15 }
 0x121   :  { %v834_v18 = vmax.f32 %v818_v16, 0.0  ;;  %v819_v19 = vadd.f32 %v1479_v25, %v796_v53 }
 0x122   :  { %v1069_v55 = vpack.c.bf16 %v836_v54, %v836_v54  ;;  %v837_v56 = vmax.f32 %v821_v17, 0.0 }
 0x123   :  { %v1067_v30 = vpack.c.bf16 %v834_v18, %v834_v18  ;;  %v835_v31 = vmax.f32 %v819_v19, 0.0 }
 0x124   :  { %917 = vst.msk [vmem:[%s1600_s3 + $0x38] sm:$0xf] %vm902_vm2, %v1069_v55  ;;  %v1070_v57 = vpack.c.bf16 %v837_v56, %v837_v56 }
 0x125   :  { %915 = vst.msk [vmem:[%s1600_s3 + $0x30] sm:$0xf] %vm902_vm2, %v1067_v30  ;;  %v1068_v58 = vpack.c.bf16 %v835_v31, %v835_v31 }
 0x126   :  { %918 = vst.msk [vmem:[%s1600_s3 + $0x3c] sm:$0xf] %vm902_vm2, %v1070_v57 }
 0x127   :  { %916 = vst.msk [vmem:[%s1600_s3 + $0x34] sm:$0xf] %vm902_vm2, %v1068_v58 }

// kernel: endewithpooling_forward.10
= control target key start
LH: loop header
LB: loop body
LE: loop exit
PB: predicated region body
PF: predicated region fallthrough
CT: control target
= control target key end

     0   :  { %v539_v0 = vmov 0   ;;  %vm109_vm0 = vcmask 130048   ;;  %vm442_vm1 = vcmask 257024   ;;  %s710_s1 = inlined_call_operand.vmem [shape: bf16[144,32], index: 1, kind: input, shape index: {}]   ;;  %s711_s0 = inlined_call_operand.vmem [shape: bf16[4,32,144], index: 0, kind: input, shape index: {}]   ;;  %s712_s2 = inlined_call_operand.vmem [shape: f32[1,32], index: 2, kind: input, shape index: {}]   ;;  %s713_s3 = inlined_call_operand.vmem [shape: bf16[32,32], index: 3, kind: output, shape index: {}]  }
   0x1   :  { %116 = vmatprep.subr.bf16.mxu0 %v539_v0  ;;  %194 = vmatprep.subr.bf16.mxu1 %v539_v0  ;;  %v506_v1 = vld [vmem:[%s710_s1] sm:$0xff]   ;;  %v507_v2 = vld [vmem:[%s710_s1 + $0x8] sm:$0xff]   ;;  %v573_v3 = vld [vmem:[%s710_s1 + $0x10] sm:$0xff]  }
   0x2   :  { %117 = vmatpush1.bf16.msra.mxu0 %v506_v1  ;;  %195 = vmatpush1.bf16.msra.mxu1 %v506_v1  ;;  %v580_v4 = vld [vmem:[%s710_s1 + $0x18] sm:$0xff]   ;;  %v517_v5 = vld [vmem:[%s711_s0 + $0x4] ss:$8 sps:$4 sm:$0xff]   ;;  %v512_v9 = vld [vmem:[%s710_s1 + $0x30] sm:$0xff]  }
   0x3   :  { %118 = vmatprep.subr.bf16.mxu0 %v539_v0  ;;  %196 = vmatprep.subr.bf16.mxu1 %v539_v0  ;;  %v520_v6 = vld [vmem:[%s711_s0 + $0x24] ss:$8 sps:$4 sm:$0xff]   ;;  %v513_v10 = vld [vmem:[%s710_s1 + $0x38] sm:$0xff]   ;;  %v515_v12 = vld [vmem:[%s711_s0] ss:$8 sps:$4 sm:$0xff]  }
   0x4   :  { %464 = vmatprep.mubr.msk.bf16.mxu0 %vm109_vm0, %v517_v5  ;;  %474 = vmatprep.mubr.msk.bf16.mxu1 %vm109_vm0, %v520_v6  ;;  %v510_v7 = vld [vmem:[%s710_s1 + $0x20] sm:$0xff]   ;;  %v511_v8 = vld [vmem:[%s710_s1 + $0x28] sm:$0xff]   ;;  %v521_v14 = vld [vmem:[%s711_s0 + $0x14] ss:$8 sps:$4 sm:$0xff]  }
   0x5   :  { %v514_v11 = vld [vmem:[%s710_s1 + $0x40] sm:$0xff]   ;;  %v524_v15 = vld [vmem:[%s711_s0 + $0x34] ss:$8 sps:$4 sm:$0xff]   ;;  %v523_v16 = vld [vmem:[%s711_s0 + $0x10] ss:$8 sps:$4 sm:$0xff]  }
   0x6   :  { %119 = vmatpush1.bf16.msra.mxu0 %v507_v2  ;;  %197 = vmatpush1.bf16.msra.mxu1 %v507_v2  ;;  %v518_v13 = vld [vmem:[%s711_s0 + $0x20] ss:$8 sps:$4 sm:$0xff]   ;;  %v526_v17 = vld [vmem:[%s711_s0 + $0x30] ss:$8 sps:$4 sm:$0xff]   ;;  %v529_v18 = vld [vmem:[%s711_s0 + $0x44] ss:$8 sps:$4 sm:$0xff]  }
   0x7   :  { %120 = vmatprep.subr.bf16.mxu0 %v539_v0  ;;  %198 = vmatprep.subr.bf16.mxu1 %v539_v0  ;;  %v532_v19 = vld [vmem:[%s711_s0 + $0x64] ss:$8 sps:$4 sm:$0xff]   ;;  %v527_v20 = vld [vmem:[%s711_s0 + $0x40] ss:$8 sps:$4 sm:$0xff]   ;;  %v533_v22 = vld [vmem:[%s711_s0 + $0x54] ss:$8 sps:$4 sm:$0xff]  }
   0x8   :  { %v530_v21 = vld [vmem:[%s711_s0 + $0x60] ss:$8 sps:$4 sm:$0xff]   ;;  %v535_v23 = vld [vmem:[%s711_s0 + $0x74] ss:$8 sps:$4 sm:$0xff]   ;;  %v537_v24 = vld [vmem:[%s711_s0 + $0x50] ss:$8 sps:$4 sm:$0xff]  }
   0x9   :  { %v538_v25 = vld [vmem:[%s711_s0 + $0x70] ss:$8 sps:$4 sm:$0xff]   ;;  %v496_v51 = vld [vmem:[%s712_s2] ss:$0 sm:$0xff] }
   0xa   :  { %121 = vmatpush1.bf16.msra.mxu0 %v573_v3  ;;  %199 = vmatpush1.bf16.msra.mxu1 %v573_v3 }
   0xb   :  { %122 = vmatprep.subr.bf16.mxu0 %v539_v0  ;;  %200 = vmatprep.subr.bf16.mxu1 %v539_v0 }
   0xe   :  { %123 = vmatpush1.bf16.msra.mxu0 %v580_v4  ;;  %201 = vmatpush1.bf16.msra.mxu1 %v580_v4 }
   0xf   :  { %124 = vmatprep.subr.bf16.mxu0 %v539_v0  ;;  %202 = vmatprep.subr.bf16.mxu1 %v539_v0 }
  0x12   :  { %125 = vmatpush1.bf16.msra.mxu0 %v510_v7  ;;  %203 = vmatpush1.bf16.msra.mxu1 %v510_v7 }
  0x13   :  { %126 = vmatprep.subr.bf16.mxu0 %v539_v0  ;;  %204 = vmatprep.subr.bf16.mxu1 %v539_v0 }
  0x16   :  { %127 = vmatpush1.bf16.msra.mxu0 %v511_v8  ;;  %205 = vmatpush1.bf16.msra.mxu1 %v511_v8 }
  0x17   :  { %128 = vmatprep.subr.bf16.mxu0 %v539_v0  ;;  %206 = vmatprep.subr.bf16.mxu1 %v539_v0 }
  0x1a   :  { %129 = vmatpush1.bf16.msra.mxu0 %v512_v9  ;;  %207 = vmatpush1.bf16.msra.mxu1 %v512_v9 }
  0x1b   :  { %130 = vmatprep.subr.bf16.mxu0 %v539_v0  ;;  %208 = vmatprep.subr.bf16.mxu1 %v539_v0 }
  0x1e   :  { %131 = vmatpush1.bf16.msra.mxu0 %v513_v10  ;;  %209 = vmatpush1.bf16.msra.mxu1 %v513_v10 }
  0x1f   :  { %132 = vmatprep.subr.bf16.mxu0 %v539_v0  ;;  %210 = vmatprep.subr.bf16.mxu1 %v539_v0 }
  0x22   :  { %133 = vmatpush1.bf16.msra.mxu0 %v514_v11  ;;  %211 = vmatpush1.bf16.msra.mxu1 %v514_v11 }
  0x23   :  { %276 = vmatprep.subr.bf16.mxu0 %v539_v0  ;;  %358 = vmatprep.subr.bf16.mxu1 %v539_v0 }
  0x25   :  { %149 = vmatmul.mubr.bf16.vlgmr.msra.gmra.mrb[0].mxu0 %v515_v12  ;;  %227 = vmatmul.mubr.bf16.vlgmr.msra.gmra.mrb[0].mxu1 %v518_v13 }
  0x26   :  { %277 = vmatpush1.bf16.msra.mxu0 %v506_v1  ;;  %359 = vmatpush1.bf16.msra.mxu1 %v506_v1 }
  0x27   :  { %278 = vmatprep.subr.bf16.mxu0 %v539_v0  ;;  %360 = vmatprep.subr.bf16.mxu1 %v539_v0 }
  0x28   :  { %465 = vmatprep.mubr.msk.bf16.mxu0 %vm109_vm0, %v521_v14  ;;  %475 = vmatprep.mubr.msk.bf16.mxu1 %vm109_vm0, %v524_v15 }
  0x2a   :  { %279 = vmatpush1.bf16.msra.mxu0 %v507_v2  ;;  %361 = vmatpush1.bf16.msra.mxu1 %v507_v2 }
  0x2b   :  { %280 = vmatprep.subr.bf16.mxu0 %v539_v0  ;;  %362 = vmatprep.subr.bf16.mxu1 %v539_v0 }
  0x2d   :  { %157 = vmatmul.mubr.bf16.gmra.mrb[4].mxu0 %v523_v16  ;;  %235 = vmatmul.mubr.bf16.gmra.mrb[4].mxu1 %v526_v17 }
  0x2e   :  { %281 = vmatpush1.bf16.msra.mxu0 %v573_v3  ;;  %363 = vmatpush1.bf16.msra.mxu1 %v573_v3 }
  0x2f   :  { %282 = vmatprep.subr.bf16.mxu0 %v539_v0  ;;  %364 = vmatprep.subr.bf16.mxu1 %v539_v0 }
  0x30   :  { %484 = vmatprep.mubr.msk.bf16.mxu0 %vm109_vm0, %v529_v18  ;;  %494 = vmatprep.mubr.msk.bf16.mxu1 %vm109_vm0, %v532_v19 }
  0x32   :  { %283 = vmatpush1.bf16.msra.mxu0 %v580_v4  ;;  %365 = vmatpush1.bf16.msra.mxu1 %v580_v4 }
  0x33   :  { %284 = vmatprep.subr.bf16.mxu0 %v539_v0  ;;  %366 = vmatprep.subr.bf16.mxu1 %v539_v0 }
  0x36   :  { %285 = vmatpush1.bf16.msra.mxu0 %v510_v7  ;;  %367 = vmatpush1.bf16.msra.mxu1 %v510_v7 }
  0x37   :  { %286 = vmatprep.subr.bf16.mxu0 %v539_v0  ;;  %368 = vmatprep.subr.bf16.mxu1 %v539_v0 }
  0x3a   :  { %287 = vmatpush1.bf16.msra.mxu0 %v511_v8  ;;  %369 = vmatpush1.bf16.msra.mxu1 %v511_v8 }
  0x3b   :  { %288 = vmatprep.subr.bf16.mxu0 %v539_v0  ;;  %370 = vmatprep.subr.bf16.mxu1 %v539_v0 }
  0x3e   :  { %289 = vmatpush1.bf16.msra.mxu0 %v512_v9  ;;  %371 = vmatpush1.bf16.msra.mxu1 %v512_v9 }
  0x3f   :  { %290 = vmatprep.subr.bf16.mxu0 %v539_v0  ;;  %372 = vmatprep.subr.bf16.mxu1 %v539_v0 }
  0x42   :  { %291 = vmatpush1.bf16.msra.mxu0 %v513_v10  ;;  %373 = vmatpush1.bf16.msra.mxu1 %v513_v10 }
  0x43   :  { %292 = vmatprep.subr.bf16.mxu0 %v539_v0  ;;  %374 = vmatprep.subr.bf16.mxu1 %v539_v0 }
  0x46   :  { %293 = vmatpush1.bf16.msra.mxu0 %v514_v11  ;;  %375 = vmatpush1.bf16.msra.mxu1 %v514_v11 }
  0x49   :  { %309 = vmatmul.mubr.bf16.vlgmr.msra.gmra.mrb[8].mxu0 %v527_v20  ;;  %391 = vmatmul.mubr.bf16.vlgmr.msra.gmra.mrb[8].mxu1 %v530_v21 }
  0x4a   :  { %485 = vmatprep.mubr.msk.bf16.mxu0 %vm109_vm0, %v533_v22  ;;  %495 = vmatprep.mubr.msk.bf16.mxu1 %vm109_vm0, %v535_v23 }
  0x51   :  { %317 = vmatmul.mubr.bf16.gmra.mrb[12].mxu0 %v537_v24  ;;  %399 = vmatmul.mubr.bf16.gmra.mrb[12].mxu1 %v538_v25 }
  0xf8   :  { %v150_v26 = vpop.f32.mrb[0].mxu0  ;;  %v228_v27 = vpop.f32.mrb[0].mxu1 }
  0xf9   :  { %v243_v28 = vmax.f32 %v150_v26, %v228_v27  ;;  %v152_v29 = vpop.f32.mrb[1].mxu0  ;;  %v230_v30 = vpop.f32.mrb[1].mxu1 }
  0xfa   :  { %v153_v31 = vpop.f32.mrb[2].mxu0  ;;  %v231_v32 = vpop.f32.mrb[2].mxu1 }
  0xfb   :  { %v244_v33 = vmax.f32 %v153_v31, %v231_v32  ;;  %v155_v34 = vpop.f32.mrb[3].mxu0  ;;  %v233_v35 = vpop.f32.mrb[3].mxu1 }
 0x100   :  { %v158_v36 = vpop.f32.mrb[4].mxu0  ;;  %v236_v37 = vpop.f32.mrb[4].mxu1 }
 0x101   :  { %v160_v38 = vpop.f32.mrb[5].mxu0  ;;  %v245_v39 = vmax.f32 %v158_v36, %v236_v37  ;;  %v238_v40 = vpop.f32.mrb[5].mxu1 }
 0x102   :  { %v161_v41 = vpop.f32.mrb[6].mxu0  ;;  %v239_v42 = vpop.f32.mrb[6].mxu1 }
 0x103   :  { %v163_v43 = vpop.f32.mrb[7].mxu0  ;;  %v246_v44 = vmax.f32 %v161_v41, %v239_v42  ;;  %v241_v45 = vpop.f32.mrb[7].mxu1 }
 0x11c   :  { %v310_v46 = vpop.f32.mrb[8].mxu0  ;;  %v392_v47 = vpop.f32.mrb[8].mxu1 }
 0x11d   :  { %v325_v48 = vmax.f32 %v243_v28, %v310_v46  ;;  %v312_v49 = vpop.f32.mrb[9].mxu0  ;;  %v394_v50 = vpop.f32.mrb[9].mxu1 }
 0x11e   :  { %v313_v52 = vpop.f32.mrb[10].mxu0  ;;  %v395_v53 = vpop.f32.mrb[10].mxu1 }
 0x11f   :  { %v407_v54 = vmax.f32 %v325_v48, %v392_v47  ;;  %v326_v55 = vmax.f32 %v244_v33, %v313_v52  ;;  %v315_v56 = vpop.f32.mrb[11].mxu0  ;;  %v397_v57 = vpop.f32.mrb[11].mxu1 }
 0x121   :  { %v418_v58 = vadd.f32 %v496_v51, %v407_v54  ;;  %v408_v59 = vmax.f32 %v326_v55, %v395_v53 }
 0x123   :  { %v422_v60 = vmax.f32 %v418_v58, 0.0  ;;  %v419_v61 = vadd.f32 %v496_v51, %v408_v59 }
 0x124   :  { %v318_v62 = vpop.f32.mrb[12].mxu0  ;;  %v400_v63 = vpop.f32.mrb[12].mxu1 }
 0x125   :  { %v501_v0 = vpack.c.bf16 %v422_v60, %v422_v60  ;;  %v423_v1 = vmax.f32 %v419_v61, 0.0  ;;  %v327_v2 = vmax.f32 %v245_v39, %v318_v62  ;;  %v320_v3 = vpop.f32.mrb[13].mxu0  ;;  %v402_v4 = vpop.f32.mrb[13].mxu1 }
 0x126   :  { %v321_v5 = vpop.f32.mrb[14].mxu0  ;;  %v403_v6 = vpop.f32.mrb[14].mxu1 }
 0x127   :  { %443 = vst.msk [vmem:[%s713_s3] sm:$0xf] %vm442_vm1, %v501_v0  ;;  %v502_v7 = vpack.c.bf16 %v423_v1, %v423_v1  ;;  %v409_v8 = vmax.f32 %v327_v2, %v400_v63  ;;  %v328_v9 = vmax.f32 %v246_v44, %v321_v5  ;;  %v323_v10 = vpop.f32.mrb[15].mxu0  ;;  %v405_v11 = vpop.f32.mrb[15].mxu1 }
 0x129   :  { %444 = vst.msk [vmem:[%s713_s3 + $0x4] sm:$0xf] %vm442_vm1, %v502_v7  ;;  %v420_v12 = vadd.f32 %v496_v51, %v409_v8  ;;  %v410_v13 = vmax.f32 %v328_v9, %v403_v6 }
 0x12b   :  { %v424_v14 = vmax.f32 %v420_v12, 0.0  ;;  %v421_v15 = vadd.f32 %v496_v51, %v410_v13 }
 0x12d   :  { %v503_v16 = vpack.c.bf16 %v424_v14, %v424_v14  ;;  %v425_v17 = vmax.f32 %v421_v15, 0.0 }
 0x12f   :  { %445 = vst.msk [vmem:[%s713_s3 + $0x8] sm:$0xf] %vm442_vm1, %v503_v16  ;;  %v504_v18 = vpack.c.bf16 %v425_v17, %v425_v17 }
 0x131   :  { %446 = vst.msk [vmem:[%s713_s3 + $0xc] sm:$0xf] %vm442_vm1, %v504_v18 }

// kernel: endewithpooling_forward.12
= control target key start
LH: loop header
LB: loop body
LE: loop exit
PB: predicated region body
PF: predicated region fallthrough
CT: control target
= control target key end

     0   :  { %v136_v0 = vmov 0.0   ;;  %vm137_vm0 = vmmov 0   ;;  %vm55_vm1 = vcmask 523264   ;;  %vm101_vm2 = vcmask 519168   ;;  %s179_s1 = inlined_call_operand.vmem [shape: bf16[64,64], index: 1, kind: input, shape index: {}]   ;;  %s180_s0 = inlined_call_operand.vmem [shape: bf16[8,64], index: 0, kind: input, shape index: {}]   ;;  %s181_s2 = inlined_call_operand.vmem [shape: f32[1,64], index: 2, kind: input, shape index: {}]   ;;  %s182_s3 = inlined_call_operand.vmem [shape: bf16[8,64], index: 3, kind: output, shape index: {}]  }
   0x1   :  { %118 = vmatprep.subr.bf16.mxu0 %v136_v0  ;;  %v132_v1 = vld [vmem:[%s179_s1] sm:$0xff]   ;;  %126 = vmatprep.mubr.msk.bf16.mxu0 %vm137_vm0, %v136_v0  ;;  %v133_v2 = vld [vmem:[%s179_s1 + $0x8] sm:$0xff]   ;;  %v134_v3 = vld [vmem:[%s179_s1 + $0x10] sm:$0xff]  }
   0x2   :  { %119 = vmatpush3.bf16.msra.mxu0 %v132_v1  ;;  %v135_v4 = vld [vmem:[%s179_s1 + $0x18] sm:$0xff]   ;;  %v15_v5 = vld [vmem:[%s180_s0] sm:$0xf] }
   0x3   :  { %120 = vmatprep.subr.bf16.mxu0 %v136_v0  ;;  %v107_v6 = vld [vmem:[%s181_s2] ss:$0 sm:$0xff] }
   0x6   :  { %121 = vmatpush3.bf16.msra.mxu0 %v133_v2 }
   0x7   :  { %122 = vmatprep.subr.bf16.mxu0 %v136_v0 }
   0xa   :  { %123 = vmatpush3.bf16.msra.mxu0 %v134_v3 }
   0xb   :  { %124 = vmatprep.subr.bf16.mxu0 %v136_v0 }
   0xe   :  { %125 = vmatpush3.bf16.msra.mxu0 %v135_v4 }
  0x11   :  { %127 = vmatmul.mubr.msk.bf16.vlgmr.msra.gmra.mrb[0].mxu0 %vm55_vm1, %v15_v5 }
  0xe4   :  { %v93_v7 = vpop.f32.mrb[0].mxu0 }
  0xe5   :  { %v94_v8 = vadd.f32 %v107_v6, %v93_v7  ;;  %v128_v9 = vpop.f32.mrb[1].mxu0 }
  0xe6   :  { %v96_v10 = vpop.f32.mrb[2].mxu0 }
  0xe7   :  { %v99_v11 = vmax.f32 %v94_v8, 0.0  ;;  %v129_v12 = vpop.f32.mrb[3].mxu0 }
  0xe9   :  { %v100_v13 = vpack.c.bf16 %v99_v11, %v99_v11 }
  0xeb   :  { %102 = vst.msk [vmem:[%s182_s3] sm:$0xf] %vm101_vm2, %v100_v13 }

// kernel: endewithpooling_forward.13
= control target key start
LH: loop header
LB: loop body
LE: loop exit
PB: predicated region body
PF: predicated region fallthrough
CT: control target
= control target key end

     0   :  { %s339_s1 = inlined_call_operand.vmem [shape: bf16[256,128], index: 1, kind: input, shape index: {}]   ;;  %s340_s0 = inlined_call_operand.vmem [shape: bf16[8,256], index: 0, kind: input, shape index: {}]   ;;  %s341_s2 = inlined_call_operand.vmem [shape: f32[1,128], index: 2, kind: input, shape index: {}]   ;;  %s342_s3 = inlined_call_operand.vmem [shape: f32[8,128], index: 3, kind: output, shape index: {}]  }
   0x1   :  { %v244_v0 = vld [vmem:[%s339_s1 + $0x40] sm:$0xff]   ;;  %v246_v2 = vld [vmem:[%s339_s1 + $0x48] sm:$0xff]   ;;  %v248_v4 = vld [vmem:[%s339_s1 + $0x50] sm:$0xff]  }
   0x2   :  { %v245_v1 = vld [vmem:[%s339_s1] sm:$0xff]   ;;  %222 = vmatprep.subr.bf16.mxu0 %v244_v0  ;;  %v247_v3 = vld [vmem:[%s339_s1 + $0x8] sm:$0xff]   ;;  %v249_v5 = vld [vmem:[%s339_s1 + $0x10] sm:$0xff]  }
   0x3   :  { %223 = vmatpush3.bf16.msra.mxu0 %v245_v1  ;;  %v250_v6 = vld [vmem:[%s339_s1 + $0x58] sm:$0xff]   ;;  %v252_v8 = vld [vmem:[%s339_s1 + $0x60] sm:$0xff]   ;;  %v254_v10 = vld [vmem:[%s339_s1 + $0x68] sm:$0xff]  }
   0x4   :  { %224 = vmatprep.subr.bf16.mxu0 %v246_v2  ;;  %v251_v7 = vld [vmem:[%s339_s1 + $0x18] sm:$0xff]   ;;  %v253_v9 = vld [vmem:[%s339_s1 + $0x20] sm:$0xff]   ;;  %v255_v13 = vld [vmem:[%s339_s1 + $0x28] sm:$0xff]  }
   0x5   :  { %v15_v11 = vld [vmem:[%s340_s0] sm:$0xff]  ;;  %v256_v14 = vld [vmem:[%s339_s1 + $0x70] sm:$0xff]   ;;  %v258_v16 = vld [vmem:[%s339_s1 + $0x78] sm:$0xff]  }
   0x6   :  { %v205_v12 = vcombine.high %v15_v11, %v15_v11  ;;  %v257_v15 = vld [vmem:[%s339_s1 + $0x30] sm:$0xff]   ;;  %v259_v17 = vld [vmem:[%s339_s1 + $0x38] sm:$0xff]   ;;  %v204_v18 = vcombine.low %v15_v11, %v15_v11  ;;  %v203_v20 = vld [vmem:[%s341_s2] ss:$0 sm:$0xff] }
   0x7   :  { %225 = vmatpush3.bf16.msra.mxu0 %v247_v3 }
   0x8   :  { %226 = vmatprep.subr.bf16.mxu0 %v248_v4  ;;  %190 = vmatprep.mubr.bf16.mxu0 %v205_v12 }
   0xb   :  { %227 = vmatpush3.bf16.msra.mxu0 %v249_v5 }
   0xc   :  { %228 = vmatprep.subr.bf16.mxu0 %v250_v6 }
   0xf   :  { %229 = vmatpush3.bf16.msra.mxu0 %v251_v7 }
  0x10   :  { %230 = vmatprep.subr.bf16.mxu0 %v252_v8 }
  0x13   :  { %231 = vmatpush3.bf16.msra.mxu0 %v253_v9 }
  0x14   :  { %232 = vmatprep.subr.bf16.mxu0 %v254_v10 }
  0x17   :  { %233 = vmatpush3.bf16.msra.mxu0 %v255_v13 }
  0x18   :  { %234 = vmatprep.subr.bf16.mxu0 %v256_v14 }
  0x1b   :  { %235 = vmatpush3.bf16.msra.mxu0 %v257_v15 }
  0x1c   :  { %236 = vmatprep.subr.bf16.mxu0 %v258_v16 }
  0x1f   :  { %237 = vmatpush3.bf16.msra.mxu0 %v259_v17 }
  0x22   :  { %191 = vmatmul.mubr.bf16.vlgmr.msra.gmra.mrb[0].mxu0 %v204_v18 }
  0xf5   :  { %v238_v19 = vpop.f32.mrb[0].mxu0 }
  0xf6   :  { %v239_v21 = vpop.f32.mrb[1].mxu0 }
  0xf7   :  { %v240_v22 = vadd.f32 %v239_v21, %v238_v19  ;;  %v241_v23 = vpop.f32.mrb[2].mxu0 }
  0xf8   :  { %v242_v24 = vpop.f32.mrb[3].mxu0 }
  0xf9   :  { %v193_v25 = vadd.f32 %v240_v22, %v203_v20 }
  0xfb   :  { %198 = vst [vmem:[%s342_s3] sm:$0xff] %v193_v25 }

// kernel: endewithpooling_forward.11
= control target key start
LH: loop header
LB: loop body
LE: loop exit
PB: predicated region body
PF: predicated region fallthrough
CT: control target
= control target key end

     0   :  { %v767_v0 = vmov 0.0   ;;  %vm768_vm0 = vmmov 0   ;;  %vm171_vm1 = vcmask 261120   ;;  %vm556_vm2 = vcmask 519168   ;;  %s1001_s1 = inlined_call_operand.vmem [shape: bf16[288,64], index: 1, kind: input, shape index: {}]   ;;  %s1002_s0 = inlined_call_operand.vmem [shape: bf16[4,8,288], index: 0, kind: input, shape index: {}]   ;;  %s1003_s2 = inlined_call_operand.vmem [shape: f32[1,64], index: 2, kind: input, shape index: {}]   ;;  %s1004_s3 = inlined_call_operand.vmem [shape: bf16[8,64], index: 3, kind: output, shape index: {}]  }
   0x1   :  { %703 = vmatprep.subr.bf16.mxu1 %v767_v0  ;;  %v793_v1 = vld [vmem:[%s1001_s1 + $0x40] sm:$0xff]   ;;  %707 = vmatprep.mubr.msk.bf16.mxu1 %vm768_vm0, %v767_v0  ;;  %v812_v4 = vld [vmem:[%s1001_s1 + $0x48] sm:$0xff]   ;;  %v834_v8 = vld [vmem:[%s1001_s1 + $0x50] sm:$0xff]  }
   0x2   :  { %v800_v2 = vld [vmem:[%s1001_s1 + $0x80] sm:$0xff]   ;;  %603 = vmatprep.subr.bf16.mxu0 %v793_v1  ;;  %v819_v5 = vld [vmem:[%s1001_s1 + $0x88] sm:$0xff]   ;;  %v841_v9 = vld [vmem:[%s1001_s1 + $0x10] sm:$0xff]  }
   0x3   :  { %v806_v3 = vld [vmem:[%s1001_s1] sm:$0xff]   ;;  %704 = vmatpush3.bf16.msra.mxu1 %v800_v2  ;;  %v825_v6 = vld [vmem:[%s1001_s1 + $0x8] sm:$0xff]   ;;  %v847_v10 = vld [vmem:[%s1001_s1 + $0x58] sm:$0xff]  }
   0x4   :  { %604 = vmatpush3.bf16.msra.mxu0 %v806_v3  ;;  %705 = vmatprep.subr.bf16.mxu1 %v767_v0  ;;  %v743_v7 = vld [vmem:[%s1002_s0 + $0x8] ss:$0 sps:$4 sm:$0xff]   ;;  %v856_v11 = vld [vmem:[%s1001_s1 + $0x18] sm:$0xff]   ;;  %v862_v12 = vld [vmem:[%s1001_s1 + $0x60] sm:$0xff]  }
   0x5   :  { %605 = vmatprep.subr.bf16.mxu0 %v812_v4  ;;  %v870_v13 = vld [vmem:[%s1001_s1 + $0x20] sm:$0xff]   ;;  %v876_v14 = vld [vmem:[%s1001_s1 + $0x68] sm:$0xff]   ;;  %v896_v20 = vld [vmem:[%s1001_s1 + $0x70] sm:$0xff]  }
   0x6   :  { %v51_v15 = vld [vmem:[%s1002_s0] sm:$0xff]  ;;  %v584_v17 = vld [vmem:[%s1002_s0 + $0xc] sm:$0xff]  ;;  %v910_v22 = vld [vmem:[%s1001_s1 + $0x78] sm:$0xff]  }
   0x7   :  { %706 = vmatpush3.bf16.msra.mxu1 %v819_v5  ;;  %v563_v16 = vcombine.high %v51_v15, %v51_v15  ;;  %v890_v18 = vld [vmem:[%s1001_s1 + $0x28] sm:$0xff]   ;;  %v587_v19 = vcombine.high %v584_v17, %v584_v17  ;;  %v904_v21 = vld [vmem:[%s1001_s1 + $0x30] sm:$0xff]   ;;  %v918_v23 = vld [vmem:[%s1001_s1 + $0x38] sm:$0xff]   ;;  %v562_v24 = vcombine.low %v51_v15, %v51_v15  ;;  %v586_v25 = vcombine.low %v584_v17, %v584_v17 }
   0x8   :  { %606 = vmatpush3.bf16.msra.mxu0 %v825_v6  ;;  %628 = vmatprep.subr.bf16.mxu1 %v793_v1  ;;  %v760_v26 = vld [vmem:[%s1002_s0 + $0x14] ss:$0 sps:$4 sm:$0xff]   ;;  %v590_v27 = vld [vmem:[%s1002_s0 + $0x18] sm:$0xff]  ;;  %v596_v29 = vld [vmem:[%s1002_s0 + $0x24] sm:$0xff] }
   0x9   :  { %607 = vmatprep.subr.bf16.mxu0 %v834_v8  ;;  %207 = vmatprep.mubr.bf16.mxu0 %v563_v16  ;;  %v593_v28 = vcombine.high %v590_v27, %v590_v27  ;;  %v761_v30 = vld [vmem:[%s1002_s0 + $0x20] ss:$0 sps:$4 sm:$0xff]   ;;  %v599_v31 = vcombine.high %v596_v29, %v596_v29  ;;  %v592_v32 = vcombine.low %v590_v27, %v590_v27  ;;  %v766_v34 = vld [vmem:[%s1002_s0 + $0x2c] ss:$0 sps:$4 sm:$0xff]  }
   0xa   :  { %708 = vmatmul.mubr.msk.bf16.vlgmr.msra.gmra.mrb[0].mxu1 %vm171_vm1, %v743_v7  ;;  %v598_v33 = vcombine.low %v596_v29, %v596_v29 }
   0xb   :  { %629 = vmatpush3.bf16.msra.mxu1 %v806_v3  ;;  %303 = vmatprep.mubr.bf16.mxu1 %v587_v19 }
   0xc   :  { %608 = vmatpush3.bf16.msra.mxu0 %v841_v9  ;;  %630 = vmatprep.subr.bf16.mxu1 %v812_v4 }
   0xd   :  { %609 = vmatprep.subr.bf16.mxu0 %v847_v10 }
   0xf   :  { %631 = vmatpush3.bf16.msra.mxu1 %v825_v6 }
  0x10   :  { %610 = vmatpush3.bf16.msra.mxu0 %v856_v11  ;;  %632 = vmatprep.subr.bf16.mxu1 %v834_v8 }
  0x11   :  { %611 = vmatprep.subr.bf16.mxu0 %v862_v12 }
  0x13   :  { %633 = vmatpush3.bf16.msra.mxu1 %v841_v9 }
  0x14   :  { %612 = vmatpush3.bf16.msra.mxu0 %v870_v13  ;;  %634 = vmatprep.subr.bf16.mxu1 %v847_v10 }
  0x15   :  { %613 = vmatprep.subr.bf16.mxu0 %v876_v14 }
  0x17   :  { %635 = vmatpush3.bf16.msra.mxu1 %v856_v11 }
  0x18   :  { %614 = vmatpush3.bf16.msra.mxu0 %v890_v18  ;;  %636 = vmatprep.subr.bf16.mxu1 %v862_v12 }
  0x19   :  { %615 = vmatprep.subr.bf16.mxu0 %v896_v20 }
  0x1b   :  { %637 = vmatpush3.bf16.msra.mxu1 %v870_v13 }
  0x1c   :  { %616 = vmatpush3.bf16.msra.mxu0 %v904_v21  ;;  %638 = vmatprep.subr.bf16.mxu1 %v876_v14 }
  0x1d   :  { %617 = vmatprep.subr.bf16.mxu0 %v910_v22 }
  0x1f   :  { %639 = vmatpush3.bf16.msra.mxu1 %v890_v18 }
  0x20   :  { %618 = vmatpush3.bf16.msra.mxu0 %v918_v23  ;;  %640 = vmatprep.subr.bf16.mxu1 %v896_v20 }
  0x21   :  { %711 = vmatprep.subr.bf16.mxu0 %v767_v0 }
  0x23   :  { %208 = vmatmul.mubr.bf16.vlgmr.msra.gmra.mrb[0].mxu0 %v562_v24  ;;  %641 = vmatpush3.bf16.msra.mxu1 %v904_v21 }
  0x24   :  { %712 = vmatpush3.bf16.msra.mxu0 %v800_v2  ;;  %642 = vmatprep.subr.bf16.mxu1 %v910_v22 }
  0x25   :  { %713 = vmatprep.subr.bf16.mxu0 %v767_v0  ;;  %715 = vmatprep.mubr.msk.bf16.mxu0 %vm768_vm0, %v767_v0 }
  0x27   :  { %643 = vmatpush3.bf16.msra.mxu1 %v918_v23 }
  0x28   :  { %714 = vmatpush3.bf16.msra.mxu0 %v819_v5  ;;  %719 = vmatprep.subr.bf16.mxu1 %v767_v0 }
  0x29   :  { %653 = vmatprep.subr.bf16.mxu0 %v793_v1 }
  0x2a   :  { %304 = vmatmul.mubr.bf16.vlgmr.msra.gmra.mrb[4].mxu1 %v586_v25 }
  0x2b   :  { %716 = vmatmul.mubr.msk.bf16.vlgmr.msra.gmra.mrb[4].mxu0 %vm171_vm1, %v760_v26  ;;  %720 = vmatpush3.bf16.msra.mxu1 %v800_v2 }
  0x2c   :  { %654 = vmatpush3.bf16.msra.mxu0 %v806_v3  ;;  %721 = vmatprep.subr.bf16.mxu1 %v767_v0 }
  0x2d   :  { %655 = vmatprep.subr.bf16.mxu0 %v812_v4  ;;  %723 = vmatprep.mubr.msk.bf16.mxu1 %vm768_vm0, %v767_v0 }
  0x2e   :  { %400 = vmatprep.mubr.bf16.mxu0 %v593_v28 }
  0x2f   :  { %722 = vmatpush3.bf16.msra.mxu1 %v819_v5 }
  0x30   :  { %656 = vmatpush3.bf16.msra.mxu0 %v825_v6  ;;  %678 = vmatprep.subr.bf16.mxu1 %v793_v1 }
  0x31   :  { %657 = vmatprep.subr.bf16.mxu0 %v834_v8 }
  0x32   :  { %724 = vmatmul.mubr.msk.bf16.vlgmr.msra.gmra.mrb[8].mxu1 %vm171_vm1, %v761_v30 }
  0x33   :  { %679 = vmatpush3.bf16.msra.mxu1 %v806_v3  ;;  %497 = vmatprep.mubr.bf16.mxu1 %v599_v31 }
  0x34   :  { %658 = vmatpush3.bf16.msra.mxu0 %v841_v9  ;;  %680 = vmatprep.subr.bf16.mxu1 %v812_v4 }
  0x35   :  { %659 = vmatprep.subr.bf16.mxu0 %v847_v10 }
  0x37   :  { %681 = vmatpush3.bf16.msra.mxu1 %v825_v6 }
  0x38   :  { %660 = vmatpush3.bf16.msra.mxu0 %v856_v11  ;;  %682 = vmatprep.subr.bf16.mxu1 %v834_v8 }
  0x39   :  { %661 = vmatprep.subr.bf16.mxu0 %v862_v12 }
  0x3b   :  { %683 = vmatpush3.bf16.msra.mxu1 %v841_v9 }
  0x3c   :  { %662 = vmatpush3.bf16.msra.mxu0 %v870_v13  ;;  %684 = vmatprep.subr.bf16.mxu1 %v847_v10 }
  0x3d   :  { %663 = vmatprep.subr.bf16.mxu0 %v876_v14 }
  0x3f   :  { %685 = vmatpush3.bf16.msra.mxu1 %v856_v11 }
  0x40   :  { %664 = vmatpush3.bf16.msra.mxu0 %v890_v18  ;;  %686 = vmatprep.subr.bf16.mxu1 %v862_v12 }
  0x41   :  { %665 = vmatprep.subr.bf16.mxu0 %v896_v20 }
  0x43   :  { %687 = vmatpush3.bf16.msra.mxu1 %v870_v13  ;;  %v602_v13 = vld [vmem:[%s1003_s2] ss:$0 sm:$0xff] }
  0x44   :  { %666 = vmatpush3.bf16.msra.mxu0 %v904_v21  ;;  %688 = vmatprep.subr.bf16.mxu1 %v876_v14 }
  0x45   :  { %667 = vmatprep.subr.bf16.mxu0 %v910_v22 }
  0x47   :  { %689 = vmatpush3.bf16.msra.mxu1 %v890_v18 }
  0x48   :  { %668 = vmatpush3.bf16.msra.mxu0 %v918_v23  ;;  %690 = vmatprep.subr.bf16.mxu1 %v896_v20 }
  0x49   :  { %727 = vmatprep.subr.bf16.mxu0 %v767_v0 }
  0x4b   :  { %401 = vmatmul.mubr.bf16.vlgmr.msra.gmra.mrb[8].mxu0 %v592_v32  ;;  %691 = vmatpush3.bf16.msra.mxu1 %v904_v21 }
  0x4c   :  { %728 = vmatpush3.bf16.msra.mxu0 %v800_v2  ;;  %692 = vmatprep.subr.bf16.mxu1 %v910_v22 }
  0x4d   :  { %729 = vmatprep.subr.bf16.mxu0 %v767_v0  ;;  %731 = vmatprep.mubr.msk.bf16.mxu0 %vm768_vm0, %v767_v0 }
  0x4f   :  { %693 = vmatpush3.bf16.msra.mxu1 %v918_v23 }
  0x50   :  { %730 = vmatpush3.bf16.msra.mxu0 %v819_v5 }
  0x52   :  { %498 = vmatmul.mubr.bf16.vlgmr.msra.gmra.mrb[12].mxu1 %v598_v33 }
  0x53   :  { %732 = vmatmul.mubr.msk.bf16.vlgmr.msra.gmra.mrb[12].mxu0 %vm171_vm1, %v766_v34 }
  0xdd   :  { %v249_v35 = vpop.f32.mrb[0].mxu1 }
  0xde   :  { %v709_v36 = vpop.f32.mrb[1].mxu1 }
  0xdf   :  { %v252_v37 = vpop.f32.mrb[2].mxu1 }
  0xe0   :  { %v710_v38 = vpop.f32.mrb[3].mxu1 }
  0xf6   :  { %v619_v39 = vpop.f32.mrb[0].mxu0 }
  0xf7   :  { %v620_v40 = vpop.f32.mrb[1].mxu0 }
  0xf8   :  { %v621_v41 = vadd.f32 %v620_v40, %v619_v39  ;;  %v622_v42 = vpop.f32.mrb[2].mxu0 }
  0xf9   :  { %v623_v43 = vpop.f32.mrb[3].mxu0 }
  0xfa   :  { %v250_v44 = vadd.f32 %v621_v41, %v249_v35 }
  0xfd   :  { %v644_v45 = vpop.f32.mrb[4].mxu1 }
  0xfe   :  { %v645_v46 = vpop.f32.mrb[5].mxu1  ;;  %v345_v47 = vpop.f32.mrb[4].mxu0 }
  0xff   :  { %v646_v48 = vadd.f32 %v645_v46, %v644_v45  ;;  %v647_v49 = vpop.f32.mrb[6].mxu1  ;;  %v717_v50 = vpop.f32.mrb[5].mxu0 }
 0x100   :  { %v648_v51 = vpop.f32.mrb[7].mxu1  ;;  %v348_v52 = vpop.f32.mrb[6].mxu0 }
 0x101   :  { %v346_v53 = vadd.f32 %v646_v48, %v345_v47  ;;  %v718_v54 = vpop.f32.mrb[7].mxu0 }
 0x103   :  { %v351_v55 = vmax.f32 %v250_v44, %v346_v53 }
 0x105   :  { %v442_v56 = vpop.f32.mrb[8].mxu1 }
 0x106   :  { %v725_v57 = vpop.f32.mrb[9].mxu1 }
 0x107   :  { %v445_v58 = vpop.f32.mrb[10].mxu1 }
 0x108   :  { %v726_v59 = vpop.f32.mrb[11].mxu1 }
 0x11e   :  { %v669_v60 = vpop.f32.mrb[8].mxu0 }
 0x11f   :  { %v670_v61 = vpop.f32.mrb[9].mxu0 }
 0x120   :  { %v671_v62 = vadd.f32 %v670_v61, %v669_v60  ;;  %v672_v63 = vpop.f32.mrb[10].mxu0 }
 0x121   :  { %v673_v0 = vpop.f32.mrb[11].mxu0 }
 0x122   :  { %v443_v1 = vadd.f32 %v671_v62, %v442_v56 }
 0x124   :  { %v448_v2 = vmax.f32 %v351_v55, %v443_v1 }
 0x125   :  { %v694_v3 = vpop.f32.mrb[12].mxu1 }
 0x126   :  { %v695_v4 = vpop.f32.mrb[13].mxu1  ;;  %v539_v5 = vpop.f32.mrb[12].mxu0 }
 0x127   :  { %v696_v6 = vadd.f32 %v695_v4, %v694_v3  ;;  %v697_v7 = vpop.f32.mrb[14].mxu1  ;;  %v733_v8 = vpop.f32.mrb[13].mxu0 }
 0x128   :  { %v698_v9 = vpop.f32.mrb[15].mxu1  ;;  %v542_v10 = vpop.f32.mrb[14].mxu0 }
 0x129   :  { %v540_v11 = vadd.f32 %v696_v6, %v539_v5  ;;  %v734_v12 = vpop.f32.mrb[15].mxu0 }
 0x12b   :  { %v545_v14 = vmax.f32 %v448_v2, %v540_v11 }
 0x12d   :  { %v553_v15 = vadd.f32 %v602_v13, %v545_v14 }
 0x12f   :  { %v554_v16 = vmax.f32 %v553_v15, 0.0 }
 0x131   :  { %v555_v17 = vpack.c.bf16 %v554_v16, %v554_v16 }
 0x133   :  { %557 = vst.msk [vmem:[%s1004_s3] sm:$0xf] %vm556_vm2, %v555_v17 }

// kernel: endewithpooling_forward.14
= control target key start
LH: loop header
LB: loop body
LE: loop exit
PB: predicated region body
PF: predicated region fallthrough
CT: control target
= control target key end

     0   :  { %vm55_vm0 = vcmask 261120   ;;  %vm143_vm1 = vcmask 257024   ;;  %s247_s1 = inlined_call_operand.vmem [shape: bf16[32,32], index: 1, kind: input, shape index: {}]   ;;  %s248_s0 = inlined_call_operand.vmem [shape: bf16[32,32], index: 0, kind: input, shape index: {}]   ;;  %s249_s2 = inlined_call_operand.vmem [shape: f32[1,32], index: 2, kind: input, shape index: {}]   ;;  %s250_s3 = inlined_call_operand.vmem [shape: f32[32,32], index: 3, kind: input, shape index: {}]   ;;  %s251_s4 = inlined_call_operand.vmem [shape: bf16[32,32], index: 4, kind: output, shape index: {}]  }
   0x1   :  { %v179_v0 = vld [vmem:[%s247_s1] sm:$0xff]   ;;  %v180_v1 = vld [vmem:[%s247_s1 + $0x8] sm:$0xff]   ;;  %v117_v8 = vld [vmem:[%s250_s3 + $0x10] sm:$0xff] }
   0x2   :  { %171 = vmatprep.subr.bf16.mxu0 %v179_v0  ;;  %v181_v2 = vld [vmem:[%s248_s0] sm:$0xff]   ;;  %v182_v3 = vld [vmem:[%s248_s0 + $0x8] sm:$0xff]   ;;  %v118_v16 = vld [vmem:[%s250_s3 + $0x18] sm:$0xff] }
   0x3   :  { %172 = vmatpush3.bf16.msra.mxu0 %v179_v0  ;;  %175 = vmatprep.mubr.msk.bf16.mxu0 %vm55_vm0, %v181_v2  ;;  %v152_v4 = vld [vmem:[%s249_s2] ss:$0 sm:$0xff]  ;;  %v116_v20 = vld [vmem:[%s250_s3 + $0x8] sm:$0xff] }
   0x4   :  { %173 = vmatprep.subr.bf16.mxu0 %v180_v1  ;;  %v115_v12 = vld [vmem:[%s250_s3] sm:$0xff] }
   0x7   :  { %174 = vmatpush3.bf16.msra.mxu0 %v180_v1 }
   0xa   :  { %176 = vmatmul.mubr.msk.bf16.vlgmr.msra.gmra.mrb[0].mxu0 %vm55_vm0, %v182_v3 }
  0xdd   :  { %v177_v5 = vpop.f32.mrb[0].mxu0 }
  0xde   :  { %v105_v6 = vadd.f32 %v177_v5, %v152_v4  ;;  %v96_v7 = vpop.f32.mrb[1].mxu0 }
  0xdf   :  { %v97_v9 = vadd.f32 %v152_v4, %v96_v7  ;;  %v178_v10 = vpop.f32.mrb[2].mxu0 }
  0xe0   :  { %v113_v11 = vmax.f32 %v105_v6, 0.0  ;;  %v108_v13 = vadd.f32 %v178_v10, %v152_v4  ;;  %v99_v14 = vpop.f32.mrb[3].mxu0 }
  0xe1   :  { %v111_v15 = vmax.f32 %v97_v9, 0.0  ;;  %v100_v17 = vadd.f32 %v152_v4, %v99_v14 }
  0xe2   :  { %v121_v18 = vadd.f32 %v117_v8, %v113_v11  ;;  %v114_v19 = vmax.f32 %v108_v13, 0.0 }
  0xe3   :  { %v119_v21 = vadd.f32 %v115_v12, %v111_v15  ;;  %v112_v22 = vmax.f32 %v100_v17, 0.0 }
  0xe4   :  { %v125_v23 = vmax.f32 %v121_v18, 0.0  ;;  %v122_v24 = vadd.f32 %v118_v16, %v114_v19 }
  0xe5   :  { %v123_v25 = vmax.f32 %v119_v21, 0.0  ;;  %v120_v26 = vadd.f32 %v116_v20, %v112_v22 }
  0xe6   :  { %v165_v27 = vpack.c.bf16 %v125_v23, %v125_v23  ;;  %v126_v28 = vmax.f32 %v122_v24, 0.0 }
  0xe7   :  { %v163_v29 = vpack.c.bf16 %v123_v25, %v123_v25  ;;  %v124_v30 = vmax.f32 %v120_v26, 0.0 }
  0xe8   :  { %146 = vst.msk [vmem:[%s251_s4 + $0x8] sm:$0xf] %vm143_vm1, %v165_v27  ;;  %v166_v31 = vpack.c.bf16 %v126_v28, %v126_v28 }
  0xe9   :  { %144 = vst.msk [vmem:[%s251_s4] sm:$0xf] %vm143_vm1, %v163_v29  ;;  %v164_v32 = vpack.c.bf16 %v124_v30, %v124_v30 }
  0xea   :  { %147 = vst.msk [vmem:[%s251_s4 + $0xc] sm:$0xf] %vm143_vm1, %v166_v31 }
  0xeb   :  { %145 = vst.msk [vmem:[%s251_s4 + $0x4] sm:$0xf] %vm143_vm1, %v164_v32 }

// kernel: endewithpooling_forward.15
= control target key start
LH: loop header
LB: loop body
LE: loop exit
PB: predicated region body
PF: predicated region fallthrough
CT: control target
= control target key end

     0   :  { %vm151_vm0 = vcmask 523264   ;;  %s276_s1 = inlined_call_operand.vmem [shape: bf16[128,64], index: 1, kind: input, shape index: {}]   ;;  %s277_s0 = inlined_call_operand.vmem [shape: bf16[32,128], index: 0, kind: input, shape index: {}]   ;;  %s278_s2 = inlined_call_operand.vmem [shape: f32[1,64], index: 2, kind: input, shape index: {}]   ;;  %s279_s3 = inlined_call_operand.vmem [shape: f32[32,64], index: 3, kind: output, shape index: {}]  }
   0x1   :  { %v201_v0 = vld [vmem:[%s276_s1] sm:$0xff]   ;;  %v202_v1 = vld [vmem:[%s276_s1 + $0x8] sm:$0xff]   ;;  %v203_v2 = vld [vmem:[%s276_s1 + $0x10] sm:$0xff]  }
   0x2   :  { %181 = vmatprep.subr.bf16.mxu0 %v201_v0  ;;  %v204_v3 = vld [vmem:[%s276_s1 + $0x18] sm:$0xff]   ;;  %v209_v4 = vld [vmem:[%s277_s0] sm:$0xff]   ;;  %v206_v6 = vld [vmem:[%s276_s1 + $0x28] sm:$0xff]  }
   0x3   :  { %182 = vmatpush3.bf16.msra.mxu0 %v201_v0  ;;  %197 = vmatprep.mubr.bf16.mxu0 %v209_v4  ;;  %v205_v5 = vld [vmem:[%s276_s1 + $0x20] sm:$0xff]   ;;  %v207_v7 = vld [vmem:[%s276_s1 + $0x30] sm:$0xff]   ;;  %v208_v8 = vld [vmem:[%s276_s1 + $0x38] sm:$0xff]  }
   0x4   :  { %183 = vmatprep.subr.bf16.mxu0 %v202_v1  ;;  %v210_v9 = vld [vmem:[%s277_s0 + $0x8] sm:$0xff]   ;;  %v160_v10 = vld [vmem:[%s278_s2] ss:$0 sm:$0xff] }
   0x7   :  { %184 = vmatpush3.bf16.msra.mxu0 %v202_v1 }
   0x8   :  { %185 = vmatprep.subr.bf16.mxu0 %v203_v2 }
   0xb   :  { %186 = vmatpush3.bf16.msra.mxu0 %v203_v2 }
   0xc   :  { %187 = vmatprep.subr.bf16.mxu0 %v204_v3 }
   0xf   :  { %188 = vmatpush3.bf16.msra.mxu0 %v204_v3 }
  0x10   :  { %189 = vmatprep.subr.bf16.mxu0 %v205_v5 }
  0x13   :  { %190 = vmatpush3.bf16.msra.mxu0 %v205_v5 }
  0x14   :  { %191 = vmatprep.subr.bf16.mxu0 %v206_v6 }
  0x17   :  { %192 = vmatpush3.bf16.msra.mxu0 %v206_v6 }
  0x18   :  { %193 = vmatprep.subr.bf16.mxu0 %v207_v7 }
  0x1b   :  { %194 = vmatpush3.bf16.msra.mxu0 %v207_v7 }
  0x1c   :  { %195 = vmatprep.subr.bf16.mxu0 %v208_v8 }
  0x1f   :  { %196 = vmatpush3.bf16.msra.mxu0 %v208_v8 }
  0x22   :  { %198 = vmatmul.mubr.bf16.vlgmr.msra.gmra.mrb[0].mxu0 %v210_v9 }
  0xf5   :  { %v199_v11 = vpop.f32.mrb[0].mxu0 }
  0xf6   :  { %v145_v12 = vadd.f32 %v199_v11, %v160_v10  ;;  %v136_v13 = vpop.f32.mrb[1].mxu0 }
  0xf7   :  { %v137_v14 = vadd.f32 %v160_v10, %v136_v13  ;;  %v200_v15 = vpop.f32.mrb[2].mxu0 }
  0xf8   :  { %154 = vst.msk [vmem:[%s279_s3 + $0x10] sm:$0xff] %vm151_vm0, %v145_v12  ;;  %v148_v16 = vadd.f32 %v200_v15, %v160_v10  ;;  %v139_v17 = vpop.f32.mrb[3].mxu0 }
  0xf9   :  { %152 = vst.msk [vmem:[%s279_s3] sm:$0xff] %vm151_vm0, %v137_v14  ;;  %v140_v18 = vadd.f32 %v160_v10, %v139_v17 }
  0xfa   :  { %155 = vst.msk [vmem:[%s279_s3 + $0x18] sm:$0xff] %vm151_vm0, %v148_v16 }
  0xfb   :  { %153 = vst.msk [vmem:[%s279_s3 + $0x8] sm:$0xff] %vm151_vm0, %v140_v18 }

// kernel: endewithpooling_forward.16
= control target key start
LH: loop header
LB: loop body
LE: loop exit
PB: predicated region body
PF: predicated region fallthrough
CT: control target
= control target key end

     0   :  { %vm89_vm0 = vcmask 130048   ;;  %vm339_vm1 = vcmask 125952   ;;  %s641_s1 = inlined_call_operand.vmem [shape: bf16[16,16], index: 1, kind: input, shape index: {}]   ;;  %s642_s0 = inlined_call_operand.vmem [shape: bf16[128,16], index: 0, kind: input, shape index: {}]   ;;  %s643_s2 = inlined_call_operand.vmem [shape: f32[1,16], index: 2, kind: input, shape index: {}]   ;;  %s644_s3 = inlined_call_operand.vmem [shape: f32[128,16], index: 3, kind: input, shape index: {}]   ;;  %s645_s4 = inlined_call_operand.vmem [shape: bf16[128,16], index: 4, kind: output, shape index: {}]  }
   0x1   :  { %v439_v0 = vld [vmem:[%s641_s1] sm:$0xff]   ;;  %v442_v3 = vld [vmem:[%s642_s0 + $0x8] sm:$0xff]   ;;  %v444_v5 = vld [vmem:[%s642_s0 + $0x10] sm:$0xff]  }
   0x2   :  { %v440_v1 = vld [vmem:[%s642_s0] sm:$0xff]   ;;  %419 = vmatprep.subr.bf16.mxu0 %v439_v0  ;;  %437 = vmatprep.subr.bf16.mxu1 %v439_v0  ;;  %v443_v4 = vld [vmem:[%s642_s0 + $0x28] sm:$0xff]   ;;  %v445_v6 = vld [vmem:[%s642_s0 + $0x30] sm:$0xff]  }
   0x3   :  { %v441_v2 = vld [vmem:[%s642_s0 + $0x20] sm:$0xff]   ;;  %420 = vmatpush3.bf16.msra.mxu0 %v439_v0  ;;  %438 = vmatpush3.bf16.msra.mxu1 %v439_v0  ;;  %v446_v7 = vld [vmem:[%s642_s0 + $0x18] sm:$0xff]   ;;  %v229_v16 = vld [vmem:[%s644_s3 + $0x10] sm:$0xff] }
   0x4   :  { %421 = vmatprep.mubr.msk.bf16.mxu0 %vm89_vm0, %v440_v1  ;;  %429 = vmatprep.mubr.msk.bf16.mxu1 %vm89_vm0, %v441_v2  ;;  %v447_v8 = vld [vmem:[%s642_s0 + $0x38] sm:$0xff]   ;;  %v511_v9 = vld [vmem:[%s643_s2] ss:$0 sm:$0xff]  ;;  %v237_v17 = vld [vmem:[%s644_s3 + $0x50] sm:$0xff] }
   0x5   :  { %v227_v24 = vld [vmem:[%s644_s3] sm:$0xff]  ;;  %v230_v32 = vld [vmem:[%s644_s3 + $0x18] sm:$0xff]  ;;  %v228_v40 = vld [vmem:[%s644_s3 + $0x8] sm:$0xff] }
   0x6   :  { %422 = vmatmul.mubr.msk.bf16.vlgmr.msra.gmra.mrb[0].mxu0 %vm89_vm0, %v442_v3  ;;  %430 = vmatmul.mubr.msk.bf16.vlgmr.msra.gmra.mrb[0].mxu1 %vm89_vm0, %v443_v4  ;;  %v235_v25 = vld [vmem:[%s644_s3 + $0x40] sm:$0xff]  ;;  %v238_v33 = vld [vmem:[%s644_s3 + $0x58] sm:$0xff]  ;;  %v236_v41 = vld [vmem:[%s644_s3 + $0x48] sm:$0xff] }
   0x7   :  { %425 = vmatprep.mubr.msk.bf16.mxu0 %vm89_vm0, %v444_v5  ;;  %433 = vmatprep.mubr.msk.bf16.mxu1 %vm89_vm0, %v445_v6 }
   0xe   :  { %426 = vmatmul.mubr.msk.bf16.gmra.mrb[4].mxu0 %vm89_vm0, %v446_v7  ;;  %434 = vmatmul.mubr.msk.bf16.gmra.mrb[4].mxu1 %vm89_vm0, %v447_v8 }
  0xd9   :  { %v423_v10 = vpop.f32.mrb[0].mxu0  ;;  %v431_v11 = vpop.f32.mrb[0].mxu1 }
  0xda   :  { %v157_v12 = vadd.f32 %v423_v10, %v511_v9  ;;  %v189_v13 = vadd.f32 %v431_v11, %v511_v9  ;;  %v148_v14 = vpop.f32.mrb[1].mxu0  ;;  %v180_v15 = vpop.f32.mrb[1].mxu1 }
  0xdb   :  { %v149_v18 = vadd.f32 %v511_v9, %v148_v14  ;;  %v181_v19 = vadd.f32 %v511_v9, %v180_v15  ;;  %v424_v20 = vpop.f32.mrb[2].mxu0  ;;  %v432_v21 = vpop.f32.mrb[2].mxu1  ;;  %v241_v14 = vld [vmem:[%s644_s3 + $0x70] sm:$0xff] }
  0xdc   :  { %v213_v22 = vmax.f32 %v157_v12, 0.0  ;;  %v221_v23 = vmax.f32 %v189_v13, 0.0  ;;  %v160_v26 = vadd.f32 %v424_v20, %v511_v9  ;;  %v192_v27 = vadd.f32 %v432_v21, %v511_v9  ;;  %v151_v28 = vpop.f32.mrb[3].mxu0  ;;  %v183_v29 = vpop.f32.mrb[3].mxu1  ;;  %v233_v13 = vld [vmem:[%s644_s3 + $0x30] sm:$0xff]  ;;  %v239_v20 = vld [vmem:[%s644_s3 + $0x60] sm:$0xff] }
  0xdd   :  { %v211_v30 = vmax.f32 %v149_v18, 0.0  ;;  %v219_v31 = vmax.f32 %v181_v19, 0.0  ;;  %v152_v34 = vadd.f32 %v511_v9, %v151_v28  ;;  %v184_v35 = vadd.f32 %v511_v9, %v183_v29  ;;  %v231_v19 = vld [vmem:[%s644_s3 + $0x20] sm:$0xff] }
  0xde   :  { %v245_v36 = vadd.f32 %v229_v16, %v213_v22  ;;  %v253_v37 = vadd.f32 %v237_v17, %v221_v23  ;;  %v214_v38 = vmax.f32 %v160_v26, 0.0  ;;  %v222_v39 = vmax.f32 %v192_v27, 0.0  ;;  %v242_v26 = vld [vmem:[%s644_s3 + $0x78] sm:$0xff] }
  0xdf   :  { %v243_v42 = vadd.f32 %v227_v24, %v211_v30  ;;  %v251_v43 = vadd.f32 %v235_v25, %v219_v31  ;;  %v212_v44 = vmax.f32 %v152_v34, 0.0  ;;  %v220_v45 = vmax.f32 %v184_v35, 0.0  ;;  %v234_v25 = vld [vmem:[%s644_s3 + $0x38] sm:$0xff]  ;;  %v240_v34 = vld [vmem:[%s644_s3 + $0x68] sm:$0xff] }
  0xe0   :  { %v261_v46 = vmax.f32 %v245_v36, 0.0  ;;  %v269_v47 = vmax.f32 %v253_v37, 0.0  ;;  %v246_v48 = vadd.f32 %v230_v32, %v214_v38  ;;  %v254_v49 = vadd.f32 %v238_v33, %v222_v39  ;;  %v232_v33 = vld [vmem:[%s644_s3 + $0x28] sm:$0xff] }
  0xe1   :  { %v259_v50 = vmax.f32 %v243_v42, 0.0  ;;  %v267_v51 = vmax.f32 %v251_v43, 0.0  ;;  %v244_v52 = vadd.f32 %v228_v40, %v212_v44  ;;  %v252_v53 = vadd.f32 %v236_v41, %v220_v45  ;;  %v427_v54 = vpop.f32.mrb[4].mxu0  ;;  %v435_v55 = vpop.f32.mrb[4].mxu1 }
  0xe2   :  { %v396_v56 = vpack.c.bf16 %v261_v46, %v261_v46  ;;  %v404_v57 = vpack.c.bf16 %v269_v47, %v269_v47  ;;  %v262_v58 = vmax.f32 %v246_v48, 0.0  ;;  %v270_v59 = vmax.f32 %v254_v49, 0.0  ;;  %v164_v60 = vpop.f32.mrb[5].mxu0  ;;  %v196_v61 = vpop.f32.mrb[5].mxu1 }
  0xe3   :  { %v394_v62 = vpack.c.bf16 %v259_v50, %v259_v50  ;;  %v402_v63 = vpack.c.bf16 %v267_v51, %v267_v51  ;;  %v260_v0 = vmax.f32 %v244_v52, 0.0  ;;  %v268_v1 = vmax.f32 %v252_v53, 0.0  ;;  %v428_v2 = vpop.f32.mrb[6].mxu0  ;;  %v436_v3 = vpop.f32.mrb[6].mxu1 }
  0xe4   :  { %342 = vst.msk [vmem:[%s645_s4 + $0x8] sm:$0xf] %vm339_vm1, %v396_v56  ;;  %350 = vst.msk [vmem:[%s645_s4 + $0x28] sm:$0xf] %vm339_vm1, %v404_v57  ;;  %v397_v4 = vpack.c.bf16 %v262_v58, %v262_v58  ;;  %v405_v5 = vpack.c.bf16 %v270_v59, %v270_v59  ;;  %v173_v6 = vadd.f32 %v427_v54, %v511_v9  ;;  %v167_v8 = vpop.f32.mrb[7].mxu0  ;;  %v199_v10 = vpop.f32.mrb[7].mxu1 }
  0xe5   :  { %v205_v7 = vadd.f32 %v435_v55, %v511_v9  ;;  %340 = vst.msk [vmem:[%s645_s4] sm:$0xf] %vm339_vm1, %v394_v62  ;;  %348 = vst.msk [vmem:[%s645_s4 + $0x20] sm:$0xf] %vm339_vm1, %v402_v63  ;;  %v395_v11 = vpack.c.bf16 %v260_v0, %v260_v0  ;;  %v403_v12 = vpack.c.bf16 %v268_v1, %v268_v1 }
  0xe6   :  { %v165_v15 = vadd.f32 %v511_v9, %v164_v60  ;;  %v197_v16 = vadd.f32 %v511_v9, %v196_v61  ;;  %343 = vst.msk [vmem:[%s645_s4 + $0xc] sm:$0xf] %vm339_vm1, %v397_v4  ;;  %351 = vst.msk [vmem:[%s645_s4 + $0x2c] sm:$0xf] %vm339_vm1, %v405_v5  ;;  %v217_v17 = vmax.f32 %v173_v6, 0.0  ;;  %v176_v21 = vadd.f32 %v428_v2, %v511_v9 }
  0xe7   :  { %v225_v18 = vmax.f32 %v205_v7, 0.0  ;;  %v208_v22 = vadd.f32 %v436_v3, %v511_v9  ;;  %341 = vst.msk [vmem:[%s645_s4 + $0x4] sm:$0xf] %vm339_vm1, %v395_v11  ;;  %349 = vst.msk [vmem:[%s645_s4 + $0x24] sm:$0xf] %vm339_vm1, %v403_v12  ;;  %v168_v27 = vadd.f32 %v511_v9, %v167_v8  ;;  %v200_v28 = vadd.f32 %v511_v9, %v199_v10 }
  0xe8   :  { %v215_v23 = vmax.f32 %v165_v15, 0.0  ;;  %v223_v24 = vmax.f32 %v197_v16, 0.0  ;;  %v249_v29 = vadd.f32 %v233_v13, %v217_v17  ;;  %v218_v31 = vmax.f32 %v176_v21, 0.0 }
  0xe9   :  { %v257_v30 = vadd.f32 %v241_v14, %v225_v18  ;;  %v226_v32 = vmax.f32 %v208_v22, 0.0  ;;  %v216_v37 = vmax.f32 %v168_v27, 0.0  ;;  %v224_v38 = vmax.f32 %v200_v28, 0.0 }
  0xea   :  { %v247_v35 = vadd.f32 %v231_v19, %v215_v23  ;;  %v255_v36 = vadd.f32 %v239_v20, %v223_v24  ;;  %v265_v39 = vmax.f32 %v249_v29, 0.0  ;;  %v250_v41 = vadd.f32 %v234_v25, %v218_v31 }
  0xeb   :  { %v273_v40 = vmax.f32 %v257_v30, 0.0  ;;  %v258_v9 = vadd.f32 %v242_v26, %v226_v32  ;;  %v248_v44 = vadd.f32 %v232_v33, %v216_v37  ;;  %v256_v45 = vadd.f32 %v240_v34, %v224_v38 }
  0xec   :  { %v263_v42 = vmax.f32 %v247_v35, 0.0  ;;  %v271_v43 = vmax.f32 %v255_v36, 0.0  ;;  %v400_v46 = vpack.c.bf16 %v265_v39, %v265_v39  ;;  %v266_v48 = vmax.f32 %v250_v41, 0.0 }
  0xed   :  { %v408_v47 = vpack.c.bf16 %v273_v40, %v273_v40  ;;  %v274_v49 = vmax.f32 %v258_v9, 0.0  ;;  %v264_v52 = vmax.f32 %v248_v44, 0.0  ;;  %v272_v53 = vmax.f32 %v256_v45, 0.0 }
  0xee   :  { %v398_v50 = vpack.c.bf16 %v263_v42, %v263_v42  ;;  %v406_v51 = vpack.c.bf16 %v271_v43, %v271_v43  ;;  %346 = vst.msk [vmem:[%s645_s4 + $0x18] sm:$0xf] %vm339_vm1, %v400_v46  ;;  %v401_v54 = vpack.c.bf16 %v266_v48, %v266_v48 }
  0xef   :  { %354 = vst.msk [vmem:[%s645_s4 + $0x38] sm:$0xf] %vm339_vm1, %v408_v47  ;;  %v409_v55 = vpack.c.bf16 %v274_v49, %v274_v49  ;;  %v399_v56 = vpack.c.bf16 %v264_v52, %v264_v52  ;;  %v407_v57 = vpack.c.bf16 %v272_v53, %v272_v53 }
  0xf0   :  { %344 = vst.msk [vmem:[%s645_s4 + $0x10] sm:$0xf] %vm339_vm1, %v398_v50  ;;  %352 = vst.msk [vmem:[%s645_s4 + $0x30] sm:$0xf] %vm339_vm1, %v406_v51 }
  0xf1   :  { %347 = vst.msk [vmem:[%s645_s4 + $0x1c] sm:$0xf] %vm339_vm1, %v401_v54  ;;  %355 = vst.msk [vmem:[%s645_s4 + $0x3c] sm:$0xf] %vm339_vm1, %v409_v55 }
  0xf2   :  { %345 = vst.msk [vmem:[%s645_s4 + $0x14] sm:$0xf] %vm339_vm1, %v399_v56  ;;  %353 = vst.msk [vmem:[%s645_s4 + $0x34] sm:$0xf] %vm339_vm1, %v407_v57 }

// kernel: endewithpooling_forward.17
= control target key start
LH: loop header
LB: loop body
LE: loop exit
PB: predicated region body
PF: predicated region fallthrough
CT: control target
= control target key end

     0   :  { %vm116_vm0 = vcmask 523264   ;;  %vm265_vm1 = vcmask 261120   ;;  %vm459_vm2 = vcmask 31744   ;;  %s798_s1 = inlined_call_operand.vmem [shape: bf16[64,32], index: 1, kind: input, shape index: {}]   ;;  %s799_s0 = inlined_call_operand.vmem [shape: bf16[128,64], index: 0, kind: input, shape index: {}]   ;;  %s800_s3 = inlined_call_operand.vmem [shape: f32[32,4], index: 3, kind: input, shape index: {}]   ;;  %s801_s2 = inlined_call_operand.vmem [shape: f32[1,32], index: 2, kind: input, shape index: {}]   ;;  %s802_s4 = inlined_call_operand.vmem [shape: f32[1,4], index: 4, kind: input, shape index: {}]   ;;  %s803_s5 = inlined_call_operand.vmem [shape: f32[128,4], index: 5, kind: output, shape index: {}]  }
   0x1   :  { %v614_v0 = vld [vmem:[%s798_s1] sm:$0xff]   ;;  %v615_v1 = vld [vmem:[%s798_s1 + $0x8] sm:$0xff]   ;;  %v616_v2 = vld [vmem:[%s798_s1 + $0x10] sm:$0xff]  }
   0x2   :  { %550 = vmatprep.subr.bf16.mxu0 %v614_v0  ;;  %v618_v3 = vld [vmem:[%s799_s0] sm:$0xff]   ;;  %v617_v4 = vld [vmem:[%s798_s1 + $0x18] sm:$0xff]   ;;  %v619_v5 = vld [vmem:[%s799_s0 + $0x8] sm:$0xff]  }
   0x3   :  { %551 = vmatpush3.bf16.msra.mxu0 %v614_v0  ;;  %558 = vmatprep.mubr.msk.bf16.mxu0 %vm116_vm0, %v618_v3  ;;  %v620_v6 = vld [vmem:[%s799_s0 + $0x10] sm:$0xff]   ;;  %v621_v7 = vld [vmem:[%s799_s0 + $0x18] sm:$0xff]   ;;  %v622_v8 = vld [vmem:[%s799_s0 + $0x20] sm:$0xff]  }
   0x4   :  { %552 = vmatprep.subr.bf16.mxu0 %v615_v1  ;;  %v623_v9 = vld [vmem:[%s799_s0 + $0x28] sm:$0xff]   ;;  %v624_v10 = vld [vmem:[%s799_s0 + $0x30] sm:$0xff]   ;;  %v625_v11 = vld [vmem:[%s799_s0 + $0x38] sm:$0xff]  }
   0x5   :  { %v254_v12 = vld [vmem:[%s800_s3] sm:$0xff]  ;;  %v255_v13 = vld [vmem:[%s800_s3 + $0x8] sm:$0xff]  ;;  %v256_v15 = vld [vmem:[%s800_s3 + $0x10] sm:$0xff] }
   0x6   :  { %v606_v14 = vpack.c.bf16 %v255_v13, %v254_v12  ;;  %v257_v16 = vld [vmem:[%s800_s3 + $0x18] sm:$0xff]  ;;  %v480_v18 = vld [vmem:[%s801_s2] ss:$0 sm:$0xff] }
   0x7   :  { %553 = vmatpush3.bf16.msra.mxu0 %v615_v1  ;;  %v610_v17 = vpack.c.bf16 %v257_v16, %v256_v15  ;;  %v501_v3 = vld [vmem:[%s802_s4] ss:$0 sm:$0xff] }
   0x8   :  { %554 = vmatprep.subr.bf16.mxu0 %v616_v2  ;;  %607 = vmatprep.subr.bf16.mxu1 %v606_v14 }
   0x9   :  { %609 = vmatpush3.bf16.msra.mxu1 %v606_v14 }
   0xa   :  { %611 = vmatprep.subr.bf16.mxu1 %v610_v17 }
   0xb   :  { %555 = vmatpush3.bf16.msra.mxu0 %v616_v2 }
   0xc   :  { %556 = vmatprep.subr.bf16.mxu0 %v617_v4 }
   0xd   :  { %613 = vmatpush3.bf16.msra.mxu1 %v610_v17 }
   0xf   :  { %557 = vmatpush3.bf16.msra.mxu0 %v617_v4 }
  0x12   :  { %559 = vmatmul.mubr.msk.bf16.vlgmr.msra.gmra.mrb[0].mxu0 %vm116_vm0, %v619_v5 }
  0x13   :  { %562 = vmatprep.mubr.msk.bf16.mxu0 %vm116_vm0, %v620_v6 }
  0x1a   :  { %563 = vmatmul.mubr.msk.bf16.gmra.mrb[4].mxu0 %vm116_vm0, %v621_v7 }
  0x1b   :  { %566 = vmatprep.mubr.msk.bf16.mxu0 %vm116_vm0, %v622_v8 }
  0x22   :  { %567 = vmatmul.mubr.msk.bf16.gmra.mrb[8].mxu0 %vm116_vm0, %v623_v9 }
  0x23   :  { %570 = vmatprep.mubr.msk.bf16.mxu0 %vm116_vm0, %v624_v10 }
  0x2a   :  { %571 = vmatmul.mubr.msk.bf16.gmra.mrb[12].mxu0 %vm116_vm0, %v625_v11 }
  0xe5   :  { %v560_v19 = vpop.f32.mrb[0].mxu0 }
  0xe6   :  { %v175_v20 = vpop.f32.mrb[1].mxu0  ;;  %v184_v23 = vadd.f32 %v560_v19, %v480_v18 }
  0xe7   :  { %v176_v21 = vadd.f32 %v480_v18, %v175_v20  ;;  %v561_v22 = vpop.f32.mrb[2].mxu0 }
  0xe8   :  { %v178_v24 = vpop.f32.mrb[3].mxu0  ;;  %v187_v27 = vadd.f32 %v561_v22, %v480_v18  ;;  %v240_v29 = vmax.f32 %v184_v23, 0.0 }
  0xe9   :  { %v238_v25 = vmax.f32 %v176_v21, 0.0  ;;  %v179_v26 = vadd.f32 %v480_v18, %v178_v24 }
  0xea   :  { %v241_v32 = vmax.f32 %v187_v27, 0.0 }
  0xeb   :  { %v239_v28 = vmax.f32 %v179_v26, 0.0  ;;  %582 = vmatprep.mubr.msk.f32.mxu1 %vm265_vm1, %v238_v25 }
  0xed   :  { %v564_v30 = vpop.f32.mrb[4].mxu0  ;;  %583 = vmatmul.mubr.msk.f32.vlgmr.msra.gmra.mrb[0].mxu1 %vm265_vm1, %v239_v28 }
  0xee   :  { %v191_v31 = vpop.f32.mrb[5].mxu0  ;;  %585 = vmatprep.mubr.msk.f32.mxu1 %vm265_vm1, %v240_v29  ;;  %v200_v35 = vadd.f32 %v564_v30, %v480_v18 }
  0xef   :  { %v192_v33 = vadd.f32 %v480_v18, %v191_v31  ;;  %v565_v34 = vpop.f32.mrb[6].mxu0 }
  0xf0   :  { %v194_v36 = vpop.f32.mrb[7].mxu0  ;;  %v203_v39 = vadd.f32 %v565_v34, %v480_v18  ;;  %v244_v41 = vmax.f32 %v200_v35, 0.0 }
  0xf1   :  { %v242_v37 = vmax.f32 %v192_v33, 0.0  ;;  %v195_v38 = vadd.f32 %v480_v18, %v194_v36  ;;  %586 = vmatmul.mubr.msk.f32.gmra.mrb[2].mxu1 %vm265_vm1, %v241_v32 }
  0xf2   :  { %v245_v44 = vmax.f32 %v203_v39, 0.0 }
  0xf3   :  { %v243_v40 = vmax.f32 %v195_v38, 0.0  ;;  %588 = vmatprep.mubr.msk.f32.mxu1 %vm265_vm1, %v242_v37 }
  0xf5   :  { %v568_v42 = vpop.f32.mrb[8].mxu0  ;;  %589 = vmatmul.mubr.msk.f32.gmra.mrb[4].mxu1 %vm265_vm1, %v243_v40 }
  0xf6   :  { %v207_v43 = vpop.f32.mrb[9].mxu0  ;;  %591 = vmatprep.mubr.msk.f32.mxu1 %vm265_vm1, %v244_v41  ;;  %v216_v47 = vadd.f32 %v568_v42, %v480_v18 }
  0xf7   :  { %v208_v45 = vadd.f32 %v480_v18, %v207_v43  ;;  %v569_v46 = vpop.f32.mrb[10].mxu0 }
  0xf8   :  { %v210_v48 = vpop.f32.mrb[11].mxu0  ;;  %v219_v51 = vadd.f32 %v569_v46, %v480_v18  ;;  %v248_v53 = vmax.f32 %v216_v47, 0.0 }
  0xf9   :  { %v246_v49 = vmax.f32 %v208_v45, 0.0  ;;  %v211_v50 = vadd.f32 %v480_v18, %v210_v48  ;;  %592 = vmatmul.mubr.msk.f32.gmra.mrb[6].mxu1 %vm265_vm1, %v245_v44 }
  0xfa   :  { %v249_v56 = vmax.f32 %v219_v51, 0.0 }
  0xfb   :  { %v247_v52 = vmax.f32 %v211_v50, 0.0  ;;  %594 = vmatprep.mubr.msk.f32.mxu1 %vm265_vm1, %v246_v49 }
  0xfd   :  { %v572_v54 = vpop.f32.mrb[12].mxu0  ;;  %595 = vmatmul.mubr.msk.f32.gmra.mrb[8].mxu1 %vm265_vm1, %v247_v52 }
  0xfe   :  { %v223_v55 = vpop.f32.mrb[13].mxu0  ;;  %597 = vmatprep.mubr.msk.f32.mxu1 %vm265_vm1, %v248_v53  ;;  %v232_v59 = vadd.f32 %v572_v54, %v480_v18 }
  0xff   :  { %v224_v57 = vadd.f32 %v480_v18, %v223_v55  ;;  %v573_v58 = vpop.f32.mrb[14].mxu0 }
 0x100   :  { %v226_v60 = vpop.f32.mrb[15].mxu0  ;;  %v235_v63 = vadd.f32 %v573_v58, %v480_v18  ;;  %v252_v1 = vmax.f32 %v232_v59, 0.0 }
 0x101   :  { %v250_v61 = vmax.f32 %v224_v57, 0.0  ;;  %v227_v62 = vadd.f32 %v480_v18, %v226_v60  ;;  %598 = vmatmul.mubr.msk.f32.gmra.mrb[10].mxu1 %vm265_vm1, %v249_v56 }
 0x102   :  { %v253_v2 = vmax.f32 %v235_v63, 0.0 }
 0x103   :  { %v251_v0 = vmax.f32 %v227_v62, 0.0  ;;  %600 = vmatprep.mubr.msk.f32.mxu1 %vm265_vm1, %v250_v61 }
 0x105   :  { %601 = vmatmul.mubr.msk.f32.gmra.mrb[12].mxu1 %vm265_vm1, %v251_v0 }
 0x106   :  { %603 = vmatprep.mubr.msk.f32.mxu1 %vm265_vm1, %v252_v1 }
 0x109   :  { %604 = vmatmul.mubr.msk.f32.gmra.mrb[14].mxu1 %vm265_vm1, %v253_v2 }
 0x1c0   :  { %v584_v4 = vpop.f32.mrb[0].mxu1 }
 0x1c1   :  { %v386_v5 = vadd.f32 %v584_v4, %v501_v3  ;;  %v380_v6 = vpop.f32.mrb[1].mxu1 }
 0x1c2   :  { %v381_v7 = vadd.f32 %v501_v3, %v380_v6 }
 0x1c3   :  { %461 = vst.msk [vmem:[%s803_s5 + $0x8] sm:$0xff] %vm459_vm2, %v386_v5 }
 0x1c4   :  { %460 = vst.msk [vmem:[%s803_s5] sm:$0xff] %vm459_vm2, %v381_v7  ;;  %v587_v8 = vpop.f32.mrb[2].mxu1 }
 0x1c5   :  { %v396_v9 = vadd.f32 %v587_v8, %v501_v3  ;;  %v390_v10 = vpop.f32.mrb[3].mxu1 }
 0x1c6   :  { %v391_v11 = vadd.f32 %v501_v3, %v390_v10 }
 0x1c7   :  { %463 = vst.msk [vmem:[%s803_s5 + $0x18] sm:$0xff] %vm459_vm2, %v396_v9 }
 0x1c8   :  { %462 = vst.msk [vmem:[%s803_s5 + $0x10] sm:$0xff] %vm459_vm2, %v391_v11  ;;  %v590_v12 = vpop.f32.mrb[4].mxu1 }
 0x1c9   :  { %v406_v13 = vadd.f32 %v590_v12, %v501_v3  ;;  %v400_v14 = vpop.f32.mrb[5].mxu1 }
 0x1ca   :  { %v401_v15 = vadd.f32 %v501_v3, %v400_v14 }
 0x1cb   :  { %465 = vst.msk [vmem:[%s803_s5 + $0x28] sm:$0xff] %vm459_vm2, %v406_v13 }
 0x1cc   :  { %464 = vst.msk [vmem:[%s803_s5 + $0x20] sm:$0xff] %vm459_vm2, %v401_v15  ;;  %v593_v16 = vpop.f32.mrb[6].mxu1 }
 0x1cd   :  { %v416_v17 = vadd.f32 %v593_v16, %v501_v3  ;;  %v410_v18 = vpop.f32.mrb[7].mxu1 }
 0x1ce   :  { %v411_v19 = vadd.f32 %v501_v3, %v410_v18 }
 0x1cf   :  { %467 = vst.msk [vmem:[%s803_s5 + $0x38] sm:$0xff] %vm459_vm2, %v416_v17 }
 0x1d0   :  { %466 = vst.msk [vmem:[%s803_s5 + $0x30] sm:$0xff] %vm459_vm2, %v411_v19  ;;  %v596_v20 = vpop.f32.mrb[8].mxu1 }
 0x1d1   :  { %v426_v21 = vadd.f32 %v596_v20, %v501_v3  ;;  %v420_v22 = vpop.f32.mrb[9].mxu1 }
 0x1d2   :  { %v421_v23 = vadd.f32 %v501_v3, %v420_v22 }
 0x1d3   :  { %469 = vst.msk [vmem:[%s803_s5 + $0x48] sm:$0xff] %vm459_vm2, %v426_v21 }
 0x1d4   :  { %468 = vst.msk [vmem:[%s803_s5 + $0x40] sm:$0xff] %vm459_vm2, %v421_v23  ;;  %v599_v24 = vpop.f32.mrb[10].mxu1 }
 0x1d5   :  { %v436_v25 = vadd.f32 %v599_v24, %v501_v3  ;;  %v430_v26 = vpop.f32.mrb[11].mxu1 }
 0x1d6   :  { %v431_v27 = vadd.f32 %v501_v3, %v430_v26 }
 0x1d7   :  { %471 = vst.msk [vmem:[%s803_s5 + $0x58] sm:$0xff] %vm459_vm2, %v436_v25 }
 0x1d8   :  { %470 = vst.msk [vmem:[%s803_s5 + $0x50] sm:$0xff] %vm459_vm2, %v431_v27  ;;  %v602_v28 = vpop.f32.mrb[12].mxu1 }
 0x1d9   :  { %v446_v29 = vadd.f32 %v602_v28, %v501_v3  ;;  %v440_v30 = vpop.f32.mrb[13].mxu1 }
 0x1da   :  { %v441_v31 = vadd.f32 %v501_v3, %v440_v30 }
 0x1db   :  { %473 = vst.msk [vmem:[%s803_s5 + $0x68] sm:$0xff] %vm459_vm2, %v446_v29 }
 0x1dc   :  { %472 = vst.msk [vmem:[%s803_s5 + $0x60] sm:$0xff] %vm459_vm2, %v441_v31  ;;  %v605_v32 = vpop.f32.mrb[14].mxu1 }
 0x1dd   :  { %v456_v33 = vadd.f32 %v605_v32, %v501_v3  ;;  %v450_v34 = vpop.f32.mrb[15].mxu1 }
 0x1de   :  { %v451_v35 = vadd.f32 %v501_v3, %v450_v34 }
 0x1df   :  { %475 = vst.msk [vmem:[%s803_s5 + $0x78] sm:$0xff] %vm459_vm2, %v456_v33 }
 0x1e0   :  { %474 = vst.msk [vmem:[%s803_s5 + $0x70] sm:$0xff] %vm459_vm2, %v451_v35 }

</bundles_post_ra>
